<compile_context>
chip_gen: v7x
topology: tpu7x:2x2x1
jax: 0.10.0
libtpu: 0.0.40
codegen_flags: <defaults>
</compile_context>

<pallas_src>
import functools
import math

import jax
import jax.numpy as jnp
from jax.experimental import pallas as pl
from jax.experimental.pallas import tpu as pltpu


def infonce_kernel(xw_ref, ywbt_ref, w2_ref, b2_ref, lse_ref, m_sc, s_sc, *,
                   block_j, hidden):
    """One (x-column chunk) x (y-row block) step of pairwise InfoNCE scoring."""
    j = pl.program_id(1)
    n_j = pl.num_programs(1)

    @pl.when(j == 0)
    def _():
        # max(0, .) shift: initializing at 0 also covers the "+1" term of
        # exp(softplus(s)) = 1 + exp(s).
        m_sc[...] = jnp.zeros_like(m_sc)
        s_sc[...] = jnp.zeros_like(s_sc)

    block_i = lse_ref.shape[1]           # lanes: y rows of this block
    b2 = b2_ref[0]                       # SMEM scalar

    # Register-resident pairwise score chunk:
    #   rows (sublanes) = x samples of this column chunk,
    #   cols (lanes)    = y samples of this row block.
    acc = jnp.full((block_j, block_i), b2, dtype=jnp.float32)

    if hidden <= 64:
        # Small H: full static unroll (live set stays tiny).
        for k in range(hidden):
            xk = xw_ref[:, k:k + 1]                       # (block_j, 1)
            yk = ywbt_ref[k:k + 1, :]                     # (1, block_i)
            r = jnp.maximum(xk + yk, 0.0).astype(jnp.float32)
            acc = acc + w2_ref[k] * r
    else:
        # Large H: bound live ranges with a fori_loop (moderate unroll).
        def body(k, a):
            xk = xw_ref[:, pl.ds(k, 1)]
            yk = ywbt_ref[pl.ds(k, 1), :]
            r = jnp.maximum(xk + yk, 0.0).astype(jnp.float32)
            return a + w2_ref[k] * r
        acc = jax.lax.fori_loop(0, hidden, body, acc, unroll=8)

    # Online logsumexp over the x columns (sublane axis), fused with softplus:
    #   exp(softplus(s)) = 1 + exp(s)  ->  each column adds exp(-m) + exp(s - m).
    m_old = m_sc[...]                                              # (1, block_i)
    m_new = jnp.maximum(m_old, jnp.max(acc, axis=0, keepdims=True))
    chunk = jnp.sum(jnp.exp(acc - m_new), axis=0, keepdims=True)
    s_sc[...] = (s_sc[...] * jnp.exp(m_old - m_new)
                 + jnp.float32(block_j) * jnp.exp(-m_new) + chunk)
    m_sc[...] = m_new

    @pl.when(j == n_j - 1)
    def _():
        lse_ref[...] = m_sc[...] + jnp.log(s_sc[...])              # (1, block_i)


def _largest_divisor(n, step, cap):
    best = None
    c = step
    top = min(cap, n)
    while c <= top:
        if n % c == 0:
            best = c
        c += step
    return best


def _num_tensorcores_per_chip():
    try:
        kind = jax.devices()[0].device_kind.lower()
        if "v7" in kind:
            return 2
    except Exception:
        pass
    return 1


def _pick_blocks(n):
    # block_i (lane axis, y rows): multiple of 128 or the full N so the ywbt /
    # lse lane dims stay BlockSpec-legal.
    bi = _largest_divisor(n, 128, 512)
    if bi is None:
        bi = n
    elif _num_tensorcores_per_chip() == 2:
        # v7x megacore: prefer an even, >=2 number of parallel row blocks.
        while n // bi < 2 and bi % 256 == 0:
            bi //= 2
        if (n // bi) % 2 == 1 and bi % 256 == 0:
            bi //= 2
    # block_j (sublane axis, x cols / reduction): multiple of 8 or full N,
    # sized so the (block_j, block_i) f32 accumulator stays <= ~128 KiB
    # (register-resident across the H loop).
    max_elems = 32 * 1024
    bj = _largest_divisor(n, 8, max(8, max_elems // bi))
    if bj is None:
        bj = n
    return bi, bj


def _vmem_limit_bytes(n, h, bi, bj, itemsize):
    need = (2 * bj * h + 2 * h * bi) * itemsize      # double-buffered inputs
    need += 2 * bi * 4                               # lse output block
    need += 2 * bi * 4                               # m / s scratch
    need = need * 2 + (8 << 20)                      # compiler-scratch headroom
    return int(min(max(need, 16 << 20), 48 << 20))   # 48 MiB cap is v7x-safe


def infonce_forward(x, y, params, block_i=None, block_j=None,
                    compute_dtype=jnp.float32):
    n, _ = x.shape
    h = params["w1x"].shape[1]

    hi = jax.lax.Precision.HIGHEST
    xw = jnp.dot(x, params["w1x"], precision=hi)                    # (N, H)
    ywb = jnp.dot(y, params["w1y"], precision=hi) + params["b1"]    # (N, H)
    w2 = params["w2"].reshape(h).astype(jnp.float32)                # (H,) -> SMEM
    b2 = params["b2"].reshape(1).astype(jnp.float32)                # (1,) -> SMEM

    # T0 (paired / diagonal term) is O(N*H): plain JAX, removed from the kernel.
    t0 = jax.nn.softplus(
        jnp.dot(jnp.maximum(xw + ywb, 0.0), w2, precision=hi) + b2[0])   # (N,)

    bi, bj = _pick_blocks(n)
    if block_i is not None:
        bi = block_i
    if block_j is not None:
        bj = block_j
    if n % bi != 0 or n % bj != 0:
        raise ValueError(f"block sizes ({bi},{bj}) must divide n={n}")

    xw_k = xw.astype(compute_dtype)          # (N, H): x-side, rows on sublanes
    ywbt_k = ywb.T.astype(compute_dtype)     # (H, N): y-side, rows on lanes

    grid = (n // bi, n // bj)
    kernel = functools.partial(infonce_kernel, block_j=bj, hidden=h)

    lse = pl.pallas_call(
        kernel,
        out_shape=jax.ShapeDtypeStruct((1, n), jnp.float32),        # lane-dense
        grid_spec=pltpu.PrefetchScalarGridSpec(
            num_scalar_prefetch=0,
            grid=grid,
            in_specs=[
                pl.BlockSpec((bj, h), lambda i, j: (j, 0)),          # xw chunk
                pl.BlockSpec((h, bi), lambda i, j: (0, i)),          # ywb^T block
                pl.BlockSpec(memory_space=pltpu.MemorySpace.SMEM),   # w2
                pl.BlockSpec(memory_space=pltpu.MemorySpace.SMEM),   # b2
            ],
            out_specs=pl.BlockSpec((1, bi), lambda i, j: (0, i)),
            scratch_shapes=[pltpu.VMEM((1, bi), jnp.float32),        # running max
                            pltpu.VMEM((1, bi), jnp.float32)],       # running sum
        ),
        compiler_params=pltpu.CompilerParams(
            dimension_semantics=("parallel", "arbitrary"),
            vmem_limit_bytes=_vmem_limit_bytes(
                n, h, bi, bj, jnp.dtype(compute_dtype).itemsize)),
    )(xw_k, ywbt_k, w2, b2)

    lse = lse.reshape(n)

    # Tiny O(N) glue: final scalar combination of the bound.
    lower_bound = jnp.mean(t0) - (jnp.mean(lse) - jnp.log(jnp.float32(n)))
    return -lower_bound


def init_params(key, emb_dim):
    # F_func = Linear(2*emb_dim, emb_dim) -> ReLU -> Linear(emb_dim, 1) -> Softplus
    d = emb_dim
    h = emb_dim
    k1, k2, k3, k4 = jax.random.split(key, 4)
    lim1 = 1.0 / math.sqrt(2 * d)
    w1 = jax.random.uniform(k1, (2 * d, h), jnp.float32, -lim1, lim1)
    b1 = jax.random.uniform(k2, (1, h), jnp.float32, -lim1, lim1)
    lim2 = 1.0 / math.sqrt(h)
    w2 = jax.random.uniform(k3, (1, h), jnp.float32, -lim2, lim2)
    b2 = jax.random.uniform(k4, (1, 1), jnp.float32, -lim2, lim2)
    return dict(w1x=w1[:d], w1y=w1[d:], b1=b1, w2=w2, b2=b2)


def infonce_ref(x, y, p):
    # Pure-JAX reference mirroring the PyTorch forward.
    n = x.shape[0]
    hi = jax.lax.Precision.HIGHEST
    w1 = jnp.concatenate([p["w1x"], p["w1y"]], axis=0)

    def f(inp):
        hh = jnp.maximum(jnp.dot(inp, w1, precision=hi) + p["b1"][0], 0.0)
        return jax.nn.softplus(jnp.dot(hh, p["w2"][0], precision=hi) + p["b2"][0, 0])

    t0 = f(jnp.concatenate([x, y], axis=-1))                        # (N,)
    x_tile = jnp.broadcast_to(x[None, :, :], (n, n, x.shape[1]))
    y_tile = jnp.broadcast_to(y[:, None, :], (n, n, y.shape[1]))
    t1 = f(jnp.concatenate([x_tile, y_tile], axis=-1))              # (N, N)
    lb = t0.mean() - (jax.scipy.special.logsumexp(t1, axis=1).mean()
                      - jnp.log(jnp.float32(n)))
    return -lb


if __name__ == "__main__":
    emb_dim = 32          # lstm_hidden_dim = 16; F_func: 64 -> 32 -> 1
    n = 16                # sample_size

    key = jax.random.PRNGKey(0)
    kx, ky, kp = jax.random.split(key, 3)
    x_samples = jax.random.normal(kx, (n, emb_dim), jnp.float32)
    y_samples = jax.random.normal(ky, (n, emb_dim), jnp.float32)
    params = init_params(kp, emb_dim)

    fwd = jax.jit(infonce_forward)
    out = jax.block_until_ready(fwd(x_samples, y_samples, params))

    ref = infonce_ref(x_samples, y_samples, params)
    assert jnp.allclose(out, ref, rtol=1e-4, atol=1e-4), (out, ref)

    print("KERNEL_OK")
</pallas_src>

<mosaic_0001>
module attributes {stable_mosaic.version = 11 : i64} {
  func.func @infonce_kernel(%arg0: i32, %arg1: i32, %arg2: memref<16x32xf32, #tpu.memory_space<vmem>>, %arg3: memref<32x16xf32, #tpu.memory_space<vmem>>, %arg4: memref<32xf32, #tpu.memory_space<smem>>, %arg5: memref<1xf32, #tpu.memory_space<smem>>, %arg6: memref<1x16xf32, #tpu.memory_space<vmem>>, %arg7: memref<1x16xf32, #tpu.memory_space<vmem>>, %arg8: memref<1x16xf32, #tpu.memory_space<vmem>>) attributes {dimension_semantics = [#tpu.dimension_semantics<parallel>, #tpu.dimension_semantics<arbitrary>], iteration_bounds = array<i64: 1, 1>, scalar_prefetch = 0 : i64, scratch_operands = 2 : i64, tpu.core_type = #tpu.core_type<tc>, window_params = [{transform_indices = @transform_0, window_bounds = array<i64: 16, 32>}, {transform_indices = @transform_1, window_bounds = array<i64: 32, 16>}, {transform_indices = @transform_2, window_bounds = array<i64: 32>}, {transform_indices = @transform_3, window_bounds = array<i64: 1>}, {transform_indices = @transform_4, window_bounds = array<i64: 1, 16>}]} {
    %c0_i32 = arith.constant 0 : i32
    %0 = arith.cmpi eq, %arg1, %c0_i32 : i32
    %1 = arith.extui %0 : i1 to i32
    %c0_i32_0 = arith.constant 0 : i32
    %2 = arith.cmpi ne, %1, %c0_i32_0 : i32
    scf.if %2 {
      %cst_175 = arith.constant 0.000000e+00 : f32
      %382 = vector.broadcast %cst_175 : f32 to vector<1x16xf32>
      %c0_176 = arith.constant 0 : index
      %c0_177 = arith.constant 0 : index
      %383 = vector.load %arg7[%c0_176, %c0_177] : memref<1x16xf32, #tpu.memory_space<vmem>>, vector<1x16xf32>
      tpu.vector_store %arg7[%c0_176, %c0_177], %382 {strides = array<i32>} : memref<1x16xf32, #tpu.memory_space<vmem>>, vector<1x16xf32>,
      %cst_178 = arith.constant 0.000000e+00 : f32
      %384 = vector.broadcast %cst_178 : f32 to vector<1x16xf32>
      %c0_179 = arith.constant 0 : index
      %c0_180 = arith.constant 0 : index
      %385 = vector.load %arg8[%c0_179, %c0_180] : memref<1x16xf32, #tpu.memory_space<vmem>>, vector<1x16xf32>
      tpu.vector_store %arg8[%c0_179, %c0_180], %384 {strides = array<i32>} : memref<1x16xf32, #tpu.memory_space<vmem>>, vector<1x16xf32>,
    } else {
    }
    %c0 = arith.constant 0 : index
    %3 = memref.load %arg5[%c0] : memref<1xf32, #tpu.memory_space<smem>>
    %4 = vector.broadcast %3 : f32 to vector<16x16xf32>
    %c0_1 = arith.constant 0 : index
    %c0_2 = arith.constant 0 : index
    %5 = vector.load %arg2[%c0_1, %c0_2] : memref<16x32xf32, #tpu.memory_space<vmem>>, vector<16x1xf32>
    %c0_3 = arith.constant 0 : index
    %c0_4 = arith.constant 0 : index
    %6 = vector.load %arg3[%c0_3, %c0_4] : memref<32x16xf32, #tpu.memory_space<vmem>>, vector<1x16xf32>
    %7 = vector.broadcast %5 : vector<16x1xf32> to vector<16x16xf32>
    %8 = vector.broadcast %6 : vector<1x16xf32> to vector<16x16xf32>
    %9 = arith.addf %7, %8 : vector<16x16xf32>
    %cst = arith.constant 0.000000e+00 : f32
    %10 = vector.broadcast %cst : f32 to vector<16x16xf32>
    %11 = arith.maximumf %9, %10 : vector<16x16xf32>
    %c0_5 = arith.constant 0 : index
    %12 = memref.load %arg4[%c0_5] : memref<32xf32, #tpu.memory_space<smem>>
    %13 = vector.broadcast %12 : f32 to vector<16x16xf32>
    %14 = arith.mulf %13, %11 : vector<16x16xf32>
    %15 = arith.addf %4, %14 : vector<16x16xf32>
    %c0_6 = arith.constant 0 : index
    %c1 = arith.constant 1 : index
    %16 = vector.load %arg2[%c0_6, %c1] : memref<16x32xf32, #tpu.memory_space<vmem>>, vector<16x1xf32>
    %c1_7 = arith.constant 1 : index
    %c0_8 = arith.constant 0 : index
    %17 = vector.load %arg3[%c1_7, %c0_8] : memref<32x16xf32, #tpu.memory_space<vmem>>, vector<1x16xf32>
    %18 = vector.broadcast %16 : vector<16x1xf32> to vector<16x16xf32>
    %19 = vector.broadcast %17 : vector<1x16xf32> to vector<16x16xf32>
    %20 = arith.addf %18, %19 : vector<16x16xf32>
    %cst_9 = arith.constant 0.000000e+00 : f32
    %21 = vector.broadcast %cst_9 : f32 to vector<16x16xf32>
    %22 = arith.maximumf %20, %21 : vector<16x16xf32>
    %c1_10 = arith.constant 1 : index
    %23 = memref.load %arg4[%c1_10] : memref<32xf32, #tpu.memory_space<smem>>
    %24 = vector.broadcast %23 : f32 to vector<16x16xf32>
    %25 = arith.mulf %24, %22 : vector<16x16xf32>
    %26 = arith.addf %15, %25 : vector<16x16xf32>
    %c0_11 = arith.constant 0 : index
    %c2 = arith.constant 2 : index
    %27 = vector.load %arg2[%c0_11, %c2] : memref<16x32xf32, #tpu.memory_space<vmem>>, vector<16x1xf32>
    %c2_12 = arith.constant 2 : index
    %c0_13 = arith.constant 0 : index
    %28 = vector.load %arg3[%c2_12, %c0_13] : memref<32x16xf32, #tpu.memory_space<vmem>>, vector<1x16xf32>
    %29 = vector.broadcast %27 : vector<16x1xf32> to vector<16x16xf32>
    %30 = vector.broadcast %28 : vector<1x16xf32> to vector<16x16xf32>
    %31 = arith.addf %29, %30 : vector<16x16xf32>
    %cst_14 = arith.constant 0.000000e+00 : f32
    %32 = vector.broadcast %cst_14 : f32 to vector<16x16xf32>
    %33 = arith.maximumf %31, %32 : vector<16x16xf32>
    %c2_15 = arith.constant 2 : index
    %34 = memref.load %arg4[%c2_15] : memref<32xf32, #tpu.memory_space<smem>>
    %35 = vector.broadcast %34 : f32 to vector<16x16xf32>
    %36 = arith.mulf %35, %33 : vector<16x16xf32>
    %37 = arith.addf %26, %36 : vector<16x16xf32>
    %c0_16 = arith.constant 0 : index
    %c3 = arith.constant 3 : index
    %38 = vector.load %arg2[%c0_16, %c3] : memref<16x32xf32, #tpu.memory_space<vmem>>, vector<16x1xf32>
    %c3_17 = arith.constant 3 : index
    %c0_18 = arith.constant 0 : index
    %39 = vector.load %arg3[%c3_17, %c0_18] : memref<32x16xf32, #tpu.memory_space<vmem>>, vector<1x16xf32>
    %40 = vector.broadcast %38 : vector<16x1xf32> to vector<16x16xf32>
    %41 = vector.broadcast %39 : vector<1x16xf32> to vector<16x16xf32>
    %42 = arith.addf %40, %41 : vector<16x16xf32>
    %cst_19 = arith.constant 0.000000e+00 : f32
    %43 = vector.broadcast %cst_19 : f32 to vector<16x16xf32>
    %44 = arith.maximumf %42, %43 : vector<16x16xf32>
    %c3_20 = arith.constant 3 : index
    %45 = memref.load %arg4[%c3_20] : memref<32xf32, #tpu.memory_space<smem>>
    %46 = vector.broadcast %45 : f32 to vector<16x16xf32>
    %47 = arith.mulf %46, %44 : vector<16x16xf32>
    %48 = arith.addf %37, %47 : vector<16x16xf32>
    %c0_21 = arith.constant 0 : index
    %c4 = arith.constant 4 : index
    %49 = vector.load %arg2[%c0_21, %c4] : memref<16x32xf32, #tpu.memory_space<vmem>>, vector<16x1xf32>
    %c4_22 = arith.constant 4 : index
    %c0_23 = arith.constant 0 : index
    %50 = vector.load %arg3[%c4_22, %c0_23] : memref<32x16xf32, #tpu.memory_space<vmem>>, vector<1x16xf32>
    %51 = vector.broadcast %49 : vector<16x1xf32> to vector<16x16xf32>
    %52 = vector.broadcast %50 : vector<1x16xf32> to vector<16x16xf32>
    %53 = arith.addf %51, %52 : vector<16x16xf32>
    %cst_24 = arith.constant 0.000000e+00 : f32
    %54 = vector.broadcast %cst_24 : f32 to vector<16x16xf32>
    %55 = arith.maximumf %53, %54 : vector<16x16xf32>
    %c4_25 = arith.constant 4 : index
    %56 = memref.load %arg4[%c4_25] : memref<32xf32, #tpu.memory_space<smem>>
    %57 = vector.broadcast %56 : f32 to vector<16x16xf32>
    %58 = arith.mulf %57, %55 : vector<16x16xf32>
    %59 = arith.addf %48, %58 : vector<16x16xf32>
    %c0_26 = arith.constant 0 : index
    %c5 = arith.constant 5 : index
    %60 = vector.load %arg2[%c0_26, %c5] : memref<16x32xf32, #tpu.memory_space<vmem>>, vector<16x1xf32>
    %c5_27 = arith.constant 5 : index
    %c0_28 = arith.constant 0 : index
    %61 = vector.load %arg3[%c5_27, %c0_28] : memref<32x16xf32, #tpu.memory_space<vmem>>, vector<1x16xf32>
    %62 = vector.broadcast %60 : vector<16x1xf32> to vector<16x16xf32>
    %63 = vector.broadcast %61 : vector<1x16xf32> to vector<16x16xf32>
    %64 = arith.addf %62, %63 : vector<16x16xf32>
    %cst_29 = arith.constant 0.000000e+00 : f32
    %65 = vector.broadcast %cst_29 : f32 to vector<16x16xf32>
    %66 = arith.maximumf %64, %65 : vector<16x16xf32>
    %c5_30 = arith.constant 5 : index
    %67 = memref.load %arg4[%c5_30] : memref<32xf32, #tpu.memory_space<smem>>
    %68 = vector.broadcast %67 : f32 to vector<16x16xf32>
    %69 = arith.mulf %68, %66 : vector<16x16xf32>
    %70 = arith.addf %59, %69 : vector<16x16xf32>
    %c0_31 = arith.constant 0 : index
    %c6 = arith.constant 6 : index
    %71 = vector.load %arg2[%c0_31, %c6] : memref<16x32xf32, #tpu.memory_space<vmem>>, vector<16x1xf32>
    %c6_32 = arith.constant 6 : index
    %c0_33 = arith.constant 0 : index
    %72 = vector.load %arg3[%c6_32, %c0_33] : memref<32x16xf32, #tpu.memory_space<vmem>>, vector<1x16xf32>
    %73 = vector.broadcast %71 : vector<16x1xf32> to vector<16x16xf32>
    %74 = vector.broadcast %72 : vector<1x16xf32> to vector<16x16xf32>
    %75 = arith.addf %73, %74 : vector<16x16xf32>
    %cst_34 = arith.constant 0.000000e+00 : f32
    %76 = vector.broadcast %cst_34 : f32 to vector<16x16xf32>
    %77 = arith.maximumf %75, %76 : vector<16x16xf32>
    %c6_35 = arith.constant 6 : index
    %78 = memref.load %arg4[%c6_35] : memref<32xf32, #tpu.memory_space<smem>>
    %79 = vector.broadcast %78 : f32 to vector<16x16xf32>
    %80 = arith.mulf %79, %77 : vector<16x16xf32>
    %81 = arith.addf %70, %80 : vector<16x16xf32>
    %c0_36 = arith.constant 0 : index
    %c7 = arith.constant 7 : index
    %82 = vector.load %arg2[%c0_36, %c7] : memref<16x32xf32, #tpu.memory_space<vmem>>, vector<16x1xf32>
    %c7_37 = arith.constant 7 : index
    %c0_38 = arith.constant 0 : index
    %83 = vector.load %arg3[%c7_37, %c0_38] : memref<32x16xf32, #tpu.memory_space<vmem>>, vector<1x16xf32>
    %84 = vector.broadcast %82 : vector<16x1xf32> to vector<16x16xf32>
    %85 = vector.broadcast %83 : vector<1x16xf32> to vector<16x16xf32>
    %86 = arith.addf %84, %85 : vector<16x16xf32>
    %cst_39 = arith.constant 0.000000e+00 : f32
    %87 = vector.broadcast %cst_39 : f32 to vector<16x16xf32>
    %88 = arith.maximumf %86, %87 : vector<16x16xf32>
    %c7_40 = arith.constant 7 : index
    %89 = memref.load %arg4[%c7_40] : memref<32xf32, #tpu.memory_space<smem>>
    %90 = vector.broadcast %89 : f32 to vector<16x16xf32>
    %91 = arith.mulf %90, %88 : vector<16x16xf32>
    %92 = arith.addf %81, %91 : vector<16x16xf32>
    %c0_41 = arith.constant 0 : index
    %c8 = arith.constant 8 : index
    %93 = vector.load %arg2[%c0_41, %c8] : memref<16x32xf32, #tpu.memory_space<vmem>>, vector<16x1xf32>
    %c8_42 = arith.constant 8 : index
    %c0_43 = arith.constant 0 : index
    %94 = vector.load %arg3[%c8_42, %c0_43] : memref<32x16xf32, #tpu.memory_space<vmem>>, vector<1x16xf32>
    %95 = vector.broadcast %93 : vector<16x1xf32> to vector<16x16xf32>
    %96 = vector.broadcast %94 : vector<1x16xf32> to vector<16x16xf32>
    %97 = arith.addf %95, %96 : vector<16x16xf32>
    %cst_44 = arith.constant 0.000000e+00 : f32
    %98 = vector.broadcast %cst_44 : f32 to vector<16x16xf32>
    %99 = arith.maximumf %97, %98 : vector<16x16xf32>
    %c8_45 = arith.constant 8 : index
    %100 = memref.load %arg4[%c8_45] : memref<32xf32, #tpu.memory_space<smem>>
    %101 = vector.broadcast %100 : f32 to vector<16x16xf32>
    %102 = arith.mulf %101, %99 : vector<16x16xf32>
    %103 = arith.addf %92, %102 : vector<16x16xf32>
    %c0_46 = arith.constant 0 : index
    %c9 = arith.constant 9 : index
    %104 = vector.load %arg2[%c0_46, %c9] : memref<16x32xf32, #tpu.memory_space<vmem>>, vector<16x1xf32>
    %c9_47 = arith.constant 9 : index
    %c0_48 = arith.constant 0 : index
    %105 = vector.load %arg3[%c9_47, %c0_48] : memref<32x16xf32, #tpu.memory_space<vmem>>, vector<1x16xf32>
    %106 = vector.broadcast %104 : vector<16x1xf32> to vector<16x16xf32>
    %107 = vector.broadcast %105 : vector<1x16xf32> to vector<16x16xf32>
    %108 = arith.addf %106, %107 : vector<16x16xf32>
    %cst_49 = arith.constant 0.000000e+00 : f32
    %109 = vector.broadcast %cst_49 : f32 to vector<16x16xf32>
    %110 = arith.maximumf %108, %109 : vector<16x16xf32>
    %c9_50 = arith.constant 9 : index
    %111 = memref.load %arg4[%c9_50] : memref<32xf32, #tpu.memory_space<smem>>
    %112 = vector.broadcast %111 : f32 to vector<16x16xf32>
    %113 = arith.mulf %112, %110 : vector<16x16xf32>
    %114 = arith.addf %103, %113 : vector<16x16xf32>
    %c0_51 = arith.constant 0 : index
    %c10 = arith.constant 10 : index
    %115 = vector.load %arg2[%c0_51, %c10] : memref<16x32xf32, #tpu.memory_space<vmem>>, vector<16x1xf32>
    %c10_52 = arith.constant 10 : index
    %c0_53 = arith.constant 0 : index
    %116 = vector.load %arg3[%c10_52, %c0_53] : memref<32x16xf32, #tpu.memory_space<vmem>>, vector<1x16xf32>
    %117 = vector.broadcast %115 : vector<16x1xf32> to vector<16x16xf32>
    %118 = vector.broadcast %116 : vector<1x16xf32> to vector<16x16xf32>
    %119 = arith.addf %117, %118 : vector<16x16xf32>
    %cst_54 = arith.constant 0.000000e+00 : f32
    %120 = vector.broadcast %cst_54 : f32 to vector<16x16xf32>
    %121 = arith.maximumf %119, %120 : vector<16x16xf32>
    %c10_55 = arith.constant 10 : index
    %122 = memref.load %arg4[%c10_55] : memref<32xf32, #tpu.memory_space<smem>>
    %123 = vector.broadcast %122 : f32 to vector<16x16xf32>
    %124 = arith.mulf %123, %121 : vector<16x16xf32>
    %125 = arith.addf %114, %124 : vector<16x16xf32>
    %c0_56 = arith.constant 0 : index
    %c11 = arith.constant 11 : index
    %126 = vector.load %arg2[%c0_56, %c11] : memref<16x32xf32, #tpu.memory_space<vmem>>, vector<16x1xf32>
    %c11_57 = arith.constant 11 : index
    %c0_58 = arith.constant 0 : index
    %127 = vector.load %arg3[%c11_57, %c0_58] : memref<32x16xf32, #tpu.memory_space<vmem>>, vector<1x16xf32>
    %128 = vector.broadcast %126 : vector<16x1xf32> to vector<16x16xf32>
    %129 = vector.broadcast %127 : vector<1x16xf32> to vector<16x16xf32>
    %130 = arith.addf %128, %129 : vector<16x16xf32>
    %cst_59 = arith.constant 0.000000e+00 : f32
    %131 = vector.broadcast %cst_59 : f32 to vector<16x16xf32>
    %132 = arith.maximumf %130, %131 : vector<16x16xf32>
    %c11_60 = arith.constant 11 : index
    %133 = memref.load %arg4[%c11_60] : memref<32xf32, #tpu.memory_space<smem>>
    %134 = vector.broadcast %133 : f32 to vector<16x16xf32>
    %135 = arith.mulf %134, %132 : vector<16x16xf32>
    %136 = arith.addf %125, %135 : vector<16x16xf32>
    %c0_61 = arith.constant 0 : index
    %c12 = arith.constant 12 : index
    %137 = vector.load %arg2[%c0_61, %c12] : memref<16x32xf32, #tpu.memory_space<vmem>>, vector<16x1xf32>
    %c12_62 = arith.constant 12 : index
    %c0_63 = arith.constant 0 : index
    %138 = vector.load %arg3[%c12_62, %c0_63] : memref<32x16xf32, #tpu.memory_space<vmem>>, vector<1x16xf32>
    %139 = vector.broadcast %137 : vector<16x1xf32> to vector<16x16xf32>
    %140 = vector.broadcast %138 : vector<1x16xf32> to vector<16x16xf32>
    %141 = arith.addf %139, %140 : vector<16x16xf32>
    %cst_64 = arith.constant 0.000000e+00 : f32
    %142 = vector.broadcast %cst_64 : f32 to vector<16x16xf32>
    %143 = arith.maximumf %141, %142 : vector<16x16xf32>
    %c12_65 = arith.constant 12 : index
    %144 = memref.load %arg4[%c12_65] : memref<32xf32, #tpu.memory_space<smem>>
    %145 = vector.broadcast %144 : f32 to vector<16x16xf32>
    %146 = arith.mulf %145, %143 : vector<16x16xf32>
    %147 = arith.addf %136, %146 : vector<16x16xf32>
    %c0_66 = arith.constant 0 : index
    %c13 = arith.constant 13 : index
    %148 = vector.load %arg2[%c0_66, %c13] : memref<16x32xf32, #tpu.memory_space<vmem>>, vector<16x1xf32>
    %c13_67 = arith.constant 13 : index
    %c0_68 = arith.constant 0 : index
    %149 = vector.load %arg3[%c13_67, %c0_68] : memref<32x16xf32, #tpu.memory_space<vmem>>, vector<1x16xf32>
    %150 = vector.broadcast %148 : vector<16x1xf32> to vector<16x16xf32>
    %151 = vector.broadcast %149 : vector<1x16xf32> to vector<16x16xf32>
    %152 = arith.addf %150, %151 : vector<16x16xf32>
    %cst_69 = arith.constant 0.000000e+00 : f32
    %153 = vector.broadcast %cst_69 : f32 to vector<16x16xf32>
    %154 = arith.maximumf %152, %153 : vector<16x16xf32>
    %c13_70 = arith.constant 13 : index
    %155 = memref.load %arg4[%c13_70] : memref<32xf32, #tpu.memory_space<smem>>
    %156 = vector.broadcast %155 : f32 to vector<16x16xf32>
    %157 = arith.mulf %156, %154 : vector<16x16xf32>
    %158 = arith.addf %147, %157 : vector<16x16xf32>
    %c0_71 = arith.constant 0 : index
    %c14 = arith.constant 14 : index
    %159 = vector.load %arg2[%c0_71, %c14] : memref<16x32xf32, #tpu.memory_space<vmem>>, vector<16x1xf32>
    %c14_72 = arith.constant 14 : index
    %c0_73 = arith.constant 0 : index
    %160 = vector.load %arg3[%c14_72, %c0_73] : memref<32x16xf32, #tpu.memory_space<vmem>>, vector<1x16xf32>
    %161 = vector.broadcast %159 : vector<16x1xf32> to vector<16x16xf32>
    %162 = vector.broadcast %160 : vector<1x16xf32> to vector<16x16xf32>
    %163 = arith.addf %161, %162 : vector<16x16xf32>
    %cst_74 = arith.constant 0.000000e+00 : f32
    %164 = vector.broadcast %cst_74 : f32 to vector<16x16xf32>
    %165 = arith.maximumf %163, %164 : vector<16x16xf32>
    %c14_75 = arith.constant 14 : index
    %166 = memref.load %arg4[%c14_75] : memref<32xf32, #tpu.memory_space<smem>>
    %167 = vector.broadcast %166 : f32 to vector<16x16xf32>
    %168 = arith.mulf %167, %165 : vector<16x16xf32>
    %169 = arith.addf %158, %168 : vector<16x16xf32>
    %c0_76 = arith.constant 0 : index
    %c15 = arith.constant 15 : index
    %170 = vector.load %arg2[%c0_76, %c15] : memref<16x32xf32, #tpu.memory_space<vmem>>, vector<16x1xf32>
    %c15_77 = arith.constant 15 : index
    %c0_78 = arith.constant 0 : index
    %171 = vector.load %arg3[%c15_77, %c0_78] : memref<32x16xf32, #tpu.memory_space<vmem>>, vector<1x16xf32>
    %172 = vector.broadcast %170 : vector<16x1xf32> to vector<16x16xf32>
    %173 = vector.broadcast %171 : vector<1x16xf32> to vector<16x16xf32>
    %174 = arith.addf %172, %173 : vector<16x16xf32>
    %cst_79 = arith.constant 0.000000e+00 : f32
    %175 = vector.broadcast %cst_79 : f32 to vector<16x16xf32>
    %176 = arith.maximumf %174, %175 : vector<16x16xf32>
    %c15_80 = arith.constant 15 : index
    %177 = memref.load %arg4[%c15_80] : memref<32xf32, #tpu.memory_space<smem>>
    %178 = vector.broadcast %177 : f32 to vector<16x16xf32>
    %179 = arith.mulf %178, %176 : vector<16x16xf32>
    %180 = arith.addf %169, %179 : vector<16x16xf32>
    %c0_81 = arith.constant 0 : index
    %c16 = arith.constant 16 : index
    %181 = vector.load %arg2[%c0_81, %c16] : memref<16x32xf32, #tpu.memory_space<vmem>>, vector<16x1xf32>
    %c16_82 = arith.constant 16 : index
    %c0_83 = arith.constant 0 : index
    %182 = vector.load %arg3[%c16_82, %c0_83] : memref<32x16xf32, #tpu.memory_space<vmem>>, vector<1x16xf32>
    %183 = vector.broadcast %181 : vector<16x1xf32> to vector<16x16xf32>
    %184 = vector.broadcast %182 : vector<1x16xf32> to vector<16x16xf32>
    %185 = arith.addf %183, %184 : vector<16x16xf32>
    %cst_84 = arith.constant 0.000000e+00 : f32
    %186 = vector.broadcast %cst_84 : f32 to vector<16x16xf32>
    %187 = arith.maximumf %185, %186 : vector<16x16xf32>
    %c16_85 = arith.constant 16 : index
    %188 = memref.load %arg4[%c16_85] : memref<32xf32, #tpu.memory_space<smem>>
    %189 = vector.broadcast %188 : f32 to vector<16x16xf32>
    %190 = arith.mulf %189, %187 : vector<16x16xf32>
    %191 = arith.addf %180, %190 : vector<16x16xf32>
    %c0_86 = arith.constant 0 : index
    %c17 = arith.constant 17 : index
    %192 = vector.load %arg2[%c0_86, %c17] : memref<16x32xf32, #tpu.memory_space<vmem>>, vector<16x1xf32>
    %c17_87 = arith.constant 17 : index
    %c0_88 = arith.constant 0 : index
    %193 = vector.load %arg3[%c17_87, %c0_88] : memref<32x16xf32, #tpu.memory_space<vmem>>, vector<1x16xf32>
    %194 = vector.broadcast %192 : vector<16x1xf32> to vector<16x16xf32>
    %195 = vector.broadcast %193 : vector<1x16xf32> to vector<16x16xf32>
    %196 = arith.addf %194, %195 : vector<16x16xf32>
    %cst_89 = arith.constant 0.000000e+00 : f32
    %197 = vector.broadcast %cst_89 : f32 to vector<16x16xf32>
    %198 = arith.maximumf %196, %197 : vector<16x16xf32>
    %c17_90 = arith.constant 17 : index
    %199 = memref.load %arg4[%c17_90] : memref<32xf32, #tpu.memory_space<smem>>
    %200 = vector.broadcast %199 : f32 to vector<16x16xf32>
    %201 = arith.mulf %200, %198 : vector<16x16xf32>
    %202 = arith.addf %191, %201 : vector<16x16xf32>
    %c0_91 = arith.constant 0 : index
    %c18 = arith.constant 18 : index
    %203 = vector.load %arg2[%c0_91, %c18] : memref<16x32xf32, #tpu.memory_space<vmem>>, vector<16x1xf32>
    %c18_92 = arith.constant 18 : index
    %c0_93 = arith.constant 0 : index
    %204 = vector.load %arg3[%c18_92, %c0_93] : memref<32x16xf32, #tpu.memory_space<vmem>>, vector<1x16xf32>
    %205 = vector.broadcast %203 : vector<16x1xf32> to vector<16x16xf32>
    %206 = vector.broadcast %204 : vector<1x16xf32> to vector<16x16xf32>
    %207 = arith.addf %205, %206 : vector<16x16xf32>
    %cst_94 = arith.constant 0.000000e+00 : f32
    %208 = vector.broadcast %cst_94 : f32 to vector<16x16xf32>
    %209 = arith.maximumf %207, %208 : vector<16x16xf32>
    %c18_95 = arith.constant 18 : index
    %210 = memref.load %arg4[%c18_95] : memref<32xf32, #tpu.memory_space<smem>>
    %211 = vector.broadcast %210 : f32 to vector<16x16xf32>
    %212 = arith.mulf %211, %209 : vector<16x16xf32>
    %213 = arith.addf %202, %212 : vector<16x16xf32>
    %c0_96 = arith.constant 0 : index
    %c19 = arith.constant 19 : index
    %214 = vector.load %arg2[%c0_96, %c19] : memref<16x32xf32, #tpu.memory_space<vmem>>, vector<16x1xf32>
    %c19_97 = arith.constant 19 : index
    %c0_98 = arith.constant 0 : index
    %215 = vector.load %arg3[%c19_97, %c0_98] : memref<32x16xf32, #tpu.memory_space<vmem>>, vector<1x16xf32>
    %216 = vector.broadcast %214 : vector<16x1xf32> to vector<16x16xf32>
    %217 = vector.broadcast %215 : vector<1x16xf32> to vector<16x16xf32>
    %218 = arith.addf %216, %217 : vector<16x16xf32>
    %cst_99 = arith.constant 0.000000e+00 : f32
    %219 = vector.broadcast %cst_99 : f32 to vector<16x16xf32>
    %220 = arith.maximumf %218, %219 : vector<16x16xf32>
    %c19_100 = arith.constant 19 : index
    %221 = memref.load %arg4[%c19_100] : memref<32xf32, #tpu.memory_space<smem>>
    %222 = vector.broadcast %221 : f32 to vector<16x16xf32>
    %223 = arith.mulf %222, %220 : vector<16x16xf32>
    %224 = arith.addf %213, %223 : vector<16x16xf32>
    %c0_101 = arith.constant 0 : index
    %c20 = arith.constant 20 : index
    %225 = vector.load %arg2[%c0_101, %c20] : memref<16x32xf32, #tpu.memory_space<vmem>>, vector<16x1xf32>
    %c20_102 = arith.constant 20 : index
    %c0_103 = arith.constant 0 : index
    %226 = vector.load %arg3[%c20_102, %c0_103] : memref<32x16xf32, #tpu.memory_space<vmem>>, vector<1x16xf32>
    %227 = vector.broadcast %225 : vector<16x1xf32> to vector<16x16xf32>
    %228 = vector.broadcast %226 : vector<1x16xf32> to vector<16x16xf32>
    %229 = arith.addf %227, %228 : vector<16x16xf32>
    %cst_104 = arith.constant 0.000000e+00 : f32
    %230 = vector.broadcast %cst_104 : f32 to vector<16x16xf32>
    %231 = arith.maximumf %229, %230 : vector<16x16xf32>
    %c20_105 = arith.constant 20 : index
    %232 = memref.load %arg4[%c20_105] : memref<32xf32, #tpu.memory_space<smem>>
    %233 = vector.broadcast %232 : f32 to vector<16x16xf32>
    %234 = arith.mulf %233, %231 : vector<16x16xf32>
    %235 = arith.addf %224, %234 : vector<16x16xf32>
    %c0_106 = arith.constant 0 : index
    %c21 = arith.constant 21 : index
    %236 = vector.load %arg2[%c0_106, %c21] : memref<16x32xf32, #tpu.memory_space<vmem>>, vector<16x1xf32>
    %c21_107 = arith.constant 21 : index
    %c0_108 = arith.constant 0 : index
    %237 = vector.load %arg3[%c21_107, %c0_108] : memref<32x16xf32, #tpu.memory_space<vmem>>, vector<1x16xf32>
    %238 = vector.broadcast %236 : vector<16x1xf32> to vector<16x16xf32>
    %239 = vector.broadcast %237 : vector<1x16xf32> to vector<16x16xf32>
    %240 = arith.addf %238, %239 : vector<16x16xf32>
    %cst_109 = arith.constant 0.000000e+00 : f32
    %241 = vector.broadcast %cst_109 : f32 to vector<16x16xf32>
    %242 = arith.maximumf %240, %241 : vector<16x16xf32>
    %c21_110 = arith.constant 21 : index
    %243 = memref.load %arg4[%c21_110] : memref<32xf32, #tpu.memory_space<smem>>
    %244 = vector.broadcast %243 : f32 to vector<16x16xf32>
    %245 = arith.mulf %244, %242 : vector<16x16xf32>
    %246 = arith.addf %235, %245 : vector<16x16xf32>
    %c0_111 = arith.constant 0 : index
    %c22 = arith.constant 22 : index
    %247 = vector.load %arg2[%c0_111, %c22] : memref<16x32xf32, #tpu.memory_space<vmem>>, vector<16x1xf32>
    %c22_112 = arith.constant 22 : index
    %c0_113 = arith.constant 0 : index
    %248 = vector.load %arg3[%c22_112, %c0_113] : memref<32x16xf32, #tpu.memory_space<vmem>>, vector<1x16xf32>
    %249 = vector.broadcast %247 : vector<16x1xf32> to vector<16x16xf32>
    %250 = vector.broadcast %248 : vector<1x16xf32> to vector<16x16xf32>
    %251 = arith.addf %249, %250 : vector<16x16xf32>
    %cst_114 = arith.constant 0.000000e+00 : f32
    %252 = vector.broadcast %cst_114 : f32 to vector<16x16xf32>
    %253 = arith.maximumf %251, %252 : vector<16x16xf32>
    %c22_115 = arith.constant 22 : index
    %254 = memref.load %arg4[%c22_115] : memref<32xf32, #tpu.memory_space<smem>>
    %255 = vector.broadcast %254 : f32 to vector<16x16xf32>
    %256 = arith.mulf %255, %253 : vector<16x16xf32>
    %257 = arith.addf %246, %256 : vector<16x16xf32>
    %c0_116 = arith.constant 0 : index
    %c23 = arith.constant 23 : index
    %258 = vector.load %arg2[%c0_116, %c23] : memref<16x32xf32, #tpu.memory_space<vmem>>, vector<16x1xf32>
    %c23_117 = arith.constant 23 : index
    %c0_118 = arith.constant 0 : index
    %259 = vector.load %arg3[%c23_117, %c0_118] : memref<32x16xf32, #tpu.memory_space<vmem>>, vector<1x16xf32>
    %260 = vector.broadcast %258 : vector<16x1xf32> to vector<16x16xf32>
    %261 = vector.broadcast %259 : vector<1x16xf32> to vector<16x16xf32>
    %262 = arith.addf %260, %261 : vector<16x16xf32>
    %cst_119 = arith.constant 0.000000e+00 : f32
    %263 = vector.broadcast %cst_119 : f32 to vector<16x16xf32>
    %264 = arith.maximumf %262, %263 : vector<16x16xf32>
    %c23_120 = arith.constant 23 : index
    %265 = memref.load %arg4[%c23_120] : memref<32xf32, #tpu.memory_space<smem>>
    %266 = vector.broadcast %265 : f32 to vector<16x16xf32>
    %267 = arith.mulf %266, %264 : vector<16x16xf32>
    %268 = arith.addf %257, %267 : vector<16x16xf32>
    %c0_121 = arith.constant 0 : index
    %c24 = arith.constant 24 : index
    %269 = vector.load %arg2[%c0_121, %c24] : memref<16x32xf32, #tpu.memory_space<vmem>>, vector<16x1xf32>
    %c24_122 = arith.constant 24 : index
    %c0_123 = arith.constant 0 : index
    %270 = vector.load %arg3[%c24_122, %c0_123] : memref<32x16xf32, #tpu.memory_space<vmem>>, vector<1x16xf32>
    %271 = vector.broadcast %269 : vector<16x1xf32> to vector<16x16xf32>
    %272 = vector.broadcast %270 : vector<1x16xf32> to vector<16x16xf32>
    %273 = arith.addf %271, %272 : vector<16x16xf32>
    %cst_124 = arith.constant 0.000000e+00 : f32
    %274 = vector.broadcast %cst_124 : f32 to vector<16x16xf32>
    %275 = arith.maximumf %273, %274 : vector<16x16xf32>
    %c24_125 = arith.constant 24 : index
    %276 = memref.load %arg4[%c24_125] : memref<32xf32, #tpu.memory_space<smem>>
    %277 = vector.broadcast %276 : f32 to vector<16x16xf32>
    %278 = arith.mulf %277, %275 : vector<16x16xf32>
    %279 = arith.addf %268, %278 : vector<16x16xf32>
    %c0_126 = arith.constant 0 : index
    %c25 = arith.constant 25 : index
    %280 = vector.load %arg2[%c0_126, %c25] : memref<16x32xf32, #tpu.memory_space<vmem>>, vector<16x1xf32>
    %c25_127 = arith.constant 25 : index
    %c0_128 = arith.constant 0 : index
    %281 = vector.load %arg3[%c25_127, %c0_128] : memref<32x16xf32, #tpu.memory_space<vmem>>, vector<1x16xf32>
    %282 = vector.broadcast %280 : vector<16x1xf32> to vector<16x16xf32>
    %283 = vector.broadcast %281 : vector<1x16xf32> to vector<16x16xf32>
    %284 = arith.addf %282, %283 : vector<16x16xf32>
    %cst_129 = arith.constant 0.000000e+00 : f32
    %285 = vector.broadcast %cst_129 : f32 to vector<16x16xf32>
    %286 = arith.maximumf %284, %285 : vector<16x16xf32>
    %c25_130 = arith.constant 25 : index
    %287 = memref.load %arg4[%c25_130] : memref<32xf32, #tpu.memory_space<smem>>
    %288 = vector.broadcast %287 : f32 to vector<16x16xf32>
    %289 = arith.mulf %288, %286 : vector<16x16xf32>
    %290 = arith.addf %279, %289 : vector<16x16xf32>
    %c0_131 = arith.constant 0 : index
    %c26 = arith.constant 26 : index
    %291 = vector.load %arg2[%c0_131, %c26] : memref<16x32xf32, #tpu.memory_space<vmem>>, vector<16x1xf32>
    %c26_132 = arith.constant 26 : index
    %c0_133 = arith.constant 0 : index
    %292 = vector.load %arg3[%c26_132, %c0_133] : memref<32x16xf32, #tpu.memory_space<vmem>>, vector<1x16xf32>
    %293 = vector.broadcast %291 : vector<16x1xf32> to vector<16x16xf32>
    %294 = vector.broadcast %292 : vector<1x16xf32> to vector<16x16xf32>
    %295 = arith.addf %293, %294 : vector<16x16xf32>
    %cst_134 = arith.constant 0.000000e+00 : f32
    %296 = vector.broadcast %cst_134 : f32 to vector<16x16xf32>
    %297 = arith.maximumf %295, %296 : vector<16x16xf32>
    %c26_135 = arith.constant 26 : index
    %298 = memref.load %arg4[%c26_135] : memref<32xf32, #tpu.memory_space<smem>>
    %299 = vector.broadcast %298 : f32 to vector<16x16xf32>
    %300 = arith.mulf %299, %297 : vector<16x16xf32>
    %301 = arith.addf %290, %300 : vector<16x16xf32>
    %c0_136 = arith.constant 0 : index
    %c27 = arith.constant 27 : index
    %302 = vector.load %arg2[%c0_136, %c27] : memref<16x32xf32, #tpu.memory_space<vmem>>, vector<16x1xf32>
    %c27_137 = arith.constant 27 : index
    %c0_138 = arith.constant 0 : index
    %303 = vector.load %arg3[%c27_137, %c0_138] : memref<32x16xf32, #tpu.memory_space<vmem>>, vector<1x16xf32>
    %304 = vector.broadcast %302 : vector<16x1xf32> to vector<16x16xf32>
    %305 = vector.broadcast %303 : vector<1x16xf32> to vector<16x16xf32>
    %306 = arith.addf %304, %305 : vector<16x16xf32>
    %cst_139 = arith.constant 0.000000e+00 : f32
    %307 = vector.broadcast %cst_139 : f32 to vector<16x16xf32>
    %308 = arith.maximumf %306, %307 : vector<16x16xf32>
    %c27_140 = arith.constant 27 : index
    %309 = memref.load %arg4[%c27_140] : memref<32xf32, #tpu.memory_space<smem>>
    %310 = vector.broadcast %309 : f32 to vector<16x16xf32>
    %311 = arith.mulf %310, %308 : vector<16x16xf32>
    %312 = arith.addf %301, %311 : vector<16x16xf32>
    %c0_141 = arith.constant 0 : index
    %c28 = arith.constant 28 : index
    %313 = vector.load %arg2[%c0_141, %c28] : memref<16x32xf32, #tpu.memory_space<vmem>>, vector<16x1xf32>
    %c28_142 = arith.constant 28 : index
    %c0_143 = arith.constant 0 : index
    %314 = vector.load %arg3[%c28_142, %c0_143] : memref<32x16xf32, #tpu.memory_space<vmem>>, vector<1x16xf32>
    %315 = vector.broadcast %313 : vector<16x1xf32> to vector<16x16xf32>
    %316 = vector.broadcast %314 : vector<1x16xf32> to vector<16x16xf32>
    %317 = arith.addf %315, %316 : vector<16x16xf32>
    %cst_144 = arith.constant 0.000000e+00 : f32
    %318 = vector.broadcast %cst_144 : f32 to vector<16x16xf32>
    %319 = arith.maximumf %317, %318 : vector<16x16xf32>
    %c28_145 = arith.constant 28 : index
    %320 = memref.load %arg4[%c28_145] : memref<32xf32, #tpu.memory_space<smem>>
    %321 = vector.broadcast %320 : f32 to vector<16x16xf32>
    %322 = arith.mulf %321, %319 : vector<16x16xf32>
    %323 = arith.addf %312, %322 : vector<16x16xf32>
    %c0_146 = arith.constant 0 : index
    %c29 = arith.constant 29 : index
    %324 = vector.load %arg2[%c0_146, %c29] : memref<16x32xf32, #tpu.memory_space<vmem>>, vector<16x1xf32>
    %c29_147 = arith.constant 29 : index
    %c0_148 = arith.constant 0 : index
    %325 = vector.load %arg3[%c29_147, %c0_148] : memref<32x16xf32, #tpu.memory_space<vmem>>, vector<1x16xf32>
    %326 = vector.broadcast %324 : vector<16x1xf32> to vector<16x16xf32>
    %327 = vector.broadcast %325 : vector<1x16xf32> to vector<16x16xf32>
    %328 = arith.addf %326, %327 : vector<16x16xf32>
    %cst_149 = arith.constant 0.000000e+00 : f32
    %329 = vector.broadcast %cst_149 : f32 to vector<16x16xf32>
    %330 = arith.maximumf %328, %329 : vector<16x16xf32>
    %c29_150 = arith.constant 29 : index
    %331 = memref.load %arg4[%c29_150] : memref<32xf32, #tpu.memory_space<smem>>
    %332 = vector.broadcast %331 : f32 to vector<16x16xf32>
    %333 = arith.mulf %332, %330 : vector<16x16xf32>
    %334 = arith.addf %323, %333 : vector<16x16xf32>
    %c0_151 = arith.constant 0 : index
    %c30 = arith.constant 30 : index
    %335 = vector.load %arg2[%c0_151, %c30] : memref<16x32xf32, #tpu.memory_space<vmem>>, vector<16x1xf32>
    %c30_152 = arith.constant 30 : index
    %c0_153 = arith.constant 0 : index
    %336 = vector.load %arg3[%c30_152, %c0_153] : memref<32x16xf32, #tpu.memory_space<vmem>>, vector<1x16xf32>
    %337 = vector.broadcast %335 : vector<16x1xf32> to vector<16x16xf32>
    %338 = vector.broadcast %336 : vector<1x16xf32> to vector<16x16xf32>
    %339 = arith.addf %337, %338 : vector<16x16xf32>
    %cst_154 = arith.constant 0.000000e+00 : f32
    %340 = vector.broadcast %cst_154 : f32 to vector<16x16xf32>
    %341 = arith.maximumf %339, %340 : vector<16x16xf32>
    %c30_155 = arith.constant 30 : index
    %342 = memref.load %arg4[%c30_155] : memref<32xf32, #tpu.memory_space<smem>>
    %343 = vector.broadcast %342 : f32 to vector<16x16xf32>
    %344 = arith.mulf %343, %341 : vector<16x16xf32>
    %345 = arith.addf %334, %344 : vector<16x16xf32>
    %c0_156 = arith.constant 0 : index
    %c31 = arith.constant 31 : index
    %346 = vector.load %arg2[%c0_156, %c31] : memref<16x32xf32, #tpu.memory_space<vmem>>, vector<16x1xf32>
    %c31_157 = arith.constant 31 : index
    %c0_158 = arith.constant 0 : index
    %347 = vector.load %arg3[%c31_157, %c0_158] : memref<32x16xf32, #tpu.memory_space<vmem>>, vector<1x16xf32>
    %348 = vector.broadcast %346 : vector<16x1xf32> to vector<16x16xf32>
    %349 = vector.broadcast %347 : vector<1x16xf32> to vector<16x16xf32>
    %350 = arith.addf %348, %349 : vector<16x16xf32>
    %cst_159 = arith.constant 0.000000e+00 : f32
    %351 = vector.broadcast %cst_159 : f32 to vector<16x16xf32>
    %352 = arith.maximumf %350, %351 : vector<16x16xf32>
    %c31_160 = arith.constant 31 : index
    %353 = memref.load %arg4[%c31_160] : memref<32xf32, #tpu.memory_space<smem>>
    %354 = vector.broadcast %353 : f32 to vector<16x16xf32>
    %355 = arith.mulf %354, %352 : vector<16x16xf32>
    %356 = arith.addf %345, %355 : vector<16x16xf32>
    %c0_161 = arith.constant 0 : index
    %c0_162 = arith.constant 0 : index
    %357 = vector.load %arg7[%c0_161, %c0_162] : memref<1x16xf32, #tpu.memory_space<vmem>>, vector<1x16xf32>
    %cst_163 = arith.constant dense<0xFF800000> : vector<16xf32>
    %358 = vector.multi_reduction <maximumf>, %356, %cst_163 [0] : vector<16x16xf32> to vector<16xf32>
    %359 = vector.shape_cast %358 : vector<16xf32> to vector<1x16xf32>
    %360 = arith.maximumf %357, %359 : vector<1x16xf32>
    %361 = vector.broadcast %360 : vector<1x16xf32> to vector<16x16xf32>
    %362 = arith.subf %356, %361 : vector<16x16xf32>
    %363 = math.exp %362 : vector<16x16xf32>
    %cst_164 = arith.constant dense<0.000000e+00> : vector<16xf32>
    %364 = vector.multi_reduction <add>, %363, %cst_164 [0] : vector<16x16xf32> to vector<16xf32>
    %365 = vector.shape_cast %364 : vector<16xf32> to vector<1x16xf32>
    %c0_165 = arith.constant 0 : index
    %c0_166 = arith.constant 0 : index
    %366 = vector.load %arg8[%c0_165, %c0_166] : memref<1x16xf32, #tpu.memory_space<vmem>>, vector<1x16xf32>
    %367 = arith.subf %357, %360 : vector<1x16xf32>
    %368 = math.exp %367 : vector<1x16xf32>
    %369 = arith.mulf %366, %368 : vector<1x16xf32>
    %cst_167 = arith.constant 0.000000e+00 : f32
    %370 = vector.broadcast %cst_167 : f32 to vector<1x16xf32>
    %371 = arith.subf %370, %360 : vector<1x16xf32>
    %372 = math.exp %371 : vector<1x16xf32>
    %cst_168 = arith.constant 1.600000e+01 : f32
    %373 = vector.broadcast %cst_168 : f32 to vector<1x16xf32>
    %374 = arith.mulf %373, %372 : vector<1x16xf32>
    %375 = arith.addf %369, %374 : vector<1x16xf32>
    %376 = arith.addf %375, %365 : vector<1x16xf32>
    %c0_169 = arith.constant 0 : index
    %c0_170 = arith.constant 0 : index
    %377 = vector.load %arg8[%c0_169, %c0_170] : memref<1x16xf32, #tpu.memory_space<vmem>>, vector<1x16xf32>
    tpu.vector_store %arg8[%c0_169, %c0_170], %376 {strides = array<i32>} : memref<1x16xf32, #tpu.memory_space<vmem>>, vector<1x16xf32>,
    %c0_171 = arith.constant 0 : index
    %c0_172 = arith.constant 0 : index
    %378 = vector.load %arg7[%c0_171, %c0_172] : memref<1x16xf32, #tpu.memory_space<vmem>>, vector<1x16xf32>
    tpu.vector_store %arg7[%c0_171, %c0_172], %360 {strides = array<i32>} : memref<1x16xf32, #tpu.memory_space<vmem>>, vector<1x16xf32>,
    %c0_i32_173 = arith.constant 0 : i32
    %379 = arith.cmpi eq, %arg1, %c0_i32_173 : i32
    %380 = arith.extui %379 : i1 to i32
    %c0_i32_174 = arith.constant 0 : i32
    %381 = arith.cmpi ne, %380, %c0_i32_174 : i32
    scf.if %381 {
      %c0_175 = arith.constant 0 : index
      %c0_176 = arith.constant 0 : index
      %382 = vector.load %arg7[%c0_175, %c0_176] : memref<1x16xf32, #tpu.memory_space<vmem>>, vector<1x16xf32>
      %c0_177 = arith.constant 0 : index
      %c0_178 = arith.constant 0 : index
      %383 = vector.load %arg8[%c0_177, %c0_178] : memref<1x16xf32, #tpu.memory_space<vmem>>, vector<1x16xf32>
      %384 = math.log %383 : vector<1x16xf32>
      %385 = arith.addf %382, %384 : vector<1x16xf32>
      %c0_179 = arith.constant 0 : index
      %c0_180 = arith.constant 0 : index
      %386 = vector.load %arg6[%c0_179, %c0_180] : memref<1x16xf32, #tpu.memory_space<vmem>>, vector<1x16xf32>
      tpu.vector_store %arg6[%c0_179, %c0_180], %385 {strides = array<i32>} : memref<1x16xf32, #tpu.memory_space<vmem>>, vector<1x16xf32>,
    } else {
    }
    return
  }
  func.func @transform_0(%arg0: i32, %arg1: i32) -> (i32, i32) {
    %c0_i32 = arith.constant 0 : i32
    %c0_i32_0 = arith.constant 0 : i32
    return %arg1, %c0_i32 : i32, i32
  }
  func.func @transform_1(%arg0: i32, %arg1: i32) -> (i32, i32) {
    %c0_i32 = arith.constant 0 : i32
    %c0_i32_0 = arith.constant 0 : i32
    return %c0_i32, %arg0 : i32, i32
  }
  func.func @transform_2(%arg0: i32, %arg1: i32) -> i32 {
    %c0_i32 = arith.constant 0 : i32
    %c0_i32_0 = arith.constant 0 : i32
    return %c0_i32 : i32
  }
  func.func @transform_3(%arg0: i32, %arg1: i32) -> i32 {
    %c0_i32 = arith.constant 0 : i32
    %c0_i32_0 = arith.constant 0 : i32
    return %c0_i32 : i32
  }
  func.func @transform_4(%arg0: i32, %arg1: i32) -> (i32, i32) {
    %c0_i32 = arith.constant 0 : i32
    %c0_i32_0 = arith.constant 0 : i32
    return %c0_i32, %arg0 : i32, i32
  }
}

</mosaic_0001>

<bundles_post_ra>
// kernel: infonce_forward.1
= control target key start
LH: loop header
LB: loop body
LE: loop exit
PB: predicated region body
PF: predicated region fallthrough
CT: control target
= control target key end

     0   :  { %10 = vsyncpa [#allocation6], 0  ;;  %s1393_s0 = inlined_call_operand.vmem [shape: f32[16,32], index: 0, kind: input, shape index: {}]   ;;  %s1394_s1 = inlined_call_operand.vmem [shape: f32[32,16], index: 1, kind: input, shape index: {}]   ;;  %s1395_s2 = inlined_call_operand.vmem [shape: f32[32], index: 2, kind: input, shape index: {}]   ;;  %s1396_s3 = inlined_call_operand.<no memory space> [shape: f32[1], index: 3, kind: input, shape index: {}]   ;;  %s1397_s4 = inlined_call_operand.vmem [shape: f32[1,16], index: 4, kind: output, shape index: {}]  }
   0x1   :  { %s21_s17 = sshll.u32 %s1395_s2, 4  ;;  %s22_s17 = int_to_ptr.vmem [resolvable:$true] %s21_s17 }
   0x2   :  { %s1001_s18 = scalar_lea.vmem %s22_s17, 16  ;;  %p1006_p1 = scmp.lt.s32.totalorder %s22_s17, %s22_s17 }
   0x3   :  { %p1002_p0 = scmp.ne.s32.totalorder %s22_s17, %s1001_s18  ;;  %p1007_p2 = scmp.lt.s32.totalorder %s1001_s18, %s1001_s18 }
   0x5   :  { %p1008_p3 = por %p1007_p2, %p1006_p1 }
   0x7   :  { %p1009_p4 = pnand %p1008_p3, %p1002_p0 }
   0x9   :  { %1012 = shalt.err (!%p1009_p4)
}
   0xa   :  { %s1015_s19 = smov [#allocation5]  }
   0xb   :  { %24 = dma.vmem_to_smem %s22_s17, 16, %s1015_s19, [#allocation6]  }
   0xc   :  { %1013 = dma.done.wait [#allocation6], 16  }
   0xd   :  { %1014 = vsyncadd [#allocation6], 4294967280 }
   0xe   :  { %30 = sfence }
   0xf   :  { %v1080_v0 = vld [vmem:[%s1393_s0] sm:$0xff]  ;;  %v1016_v1 = vmov 1   ;;  %v1017_v2 = vmov 0   ;;  %v1087_v3 = vld [vmem:[%s1393_s0 + $0x8] sm:$0xff]  ;;  %v1018_v4 = vmov 2   ;;  %v1019_v5 = vmov 3  }
  0x10   :  { %939 = vset.pattern.permute.xlu1 %v1016_v1  ;;  %938 = vset.pattern.permute.xlu0 %v1017_v2  ;;  %v1020_v6 = vmov 4   ;;  %v1021_v7 = vmov 5   ;;  %v1022_v8 = vmov 6   ;;  %v1023_v9 = vmov 8   ;;  %v841_v31 = vld [vmem:[%s1394_s1] ss:$0 sm:$0xff] }
  0x11   :  { %69 = vperm.xlu1 %939, %v1080_v0   ;;  %45 = vperm.xlu0 %938, %v1080_v0   ;;  %v1024_v10 = vmov 9   ;;  %v1025_v11 = vmov 7   ;;  %v1026_v12 = vmov 11   ;;  %v1027_v13 = vmov 12   ;;  %s61_s24 = sld [smem:[#allocation5]]  ;;  %s1147_s25 = sld [smem:[#allocation5 + $0x1]] }
  0x12   :  { %v1028_v14 = vmov 14   ;;  %v1029_v15 = vmov 15   ;;  %v1030_v16 = vmov 10   ;;  %v1031_v17 = vmov 17   ;;  %s1149_s26 = sld [smem:[#allocation5 + $0x2]]  ;;  %s1158_s5 = sld [smem:[#allocation5 + $0x3]] }
  0x13   :  { %v1032_v18 = vmov 18   ;;  %v1033_v19 = vmov 20   ;;  %v1034_v20 = vmov 21   ;;  %v1035_v21 = vmov 13   ;;  %v842_v35 = vld [vmem:[%s1394_s1 + $0x1] ss:$0 sm:$0xff] }
  0x14   :  { %v1036_v22 = vmov 23   ;;  %v1037_v23 = vmov 24   ;;  %v1038_v24 = vmov 26   ;;  %v1039_v25 = vmov 27   ;;  %v844_v46 = vld [vmem:[%s1394_s1 + $0x2] ss:$0 sm:$0xff] }
  0x15   :  { %73 = vperm.xlu1 %939, %v1087_v3   ;;  %50 = vperm.xlu0 %938, %v1087_v3   ;;  %v1040_v26 = vmov 16   ;;  %v1041_v27 = vmov 29   ;;  %v1042_v28 = vmov 30   ;;  %v1043_v29 = vmov 31   ;;  %v846_v61 = vld [vmem:[%s1394_s1 + $0x3] ss:$0 sm:$0xff] }
  0x16   :  { %v1044_v30 = vmov 19   ;;  %v1045_v41 = vmov 22   ;;  %v39_v52 = vstv %s1396_s3  ;;  %s1169_s10 = sld [smem:[#allocation5 + $0x4]]  ;;  %s851_s14 = sld [smem:[#allocation5 + $0x5]]  ;;  %vm35_vm0 = vcmask 122880  }
  0x17   :  { %v62_v42 = vstv %s61_s24  ;;  %v85_v51 = vstv %s1147_s25  ;;  %s1185_s15 = sld [smem:[#allocation5 + $0x6]]  ;;  %s1190_s18 = sld [smem:[#allocation5 + $0x7]]  ;;  %vm781_vm1 = vcmask 130048  }
  0x18   :  { %v108_v58 = vstv %s1149_s26  ;;  %s857_s22 = sld [smem:[#allocation5 + $0x8]]  ;;  %s1206_s0 = sld [smem:[#allocation5 + $0x9]] }
  0x19   :  { %941 = vset.pattern.permute.xlu1 %v1018_v4  ;;  %940 = vset.pattern.permute.xlu0 %v1018_v4  ;;  %s1211_s25 = sld [smem:[#allocation5 + $0xa]]  ;;  %s863_s30 = sld [smem:[#allocation5 + $0xb]] }
  0x1a   :  { %96 = vperm.xlu1 %941, %v1087_v3   ;;  %92 = vperm.xlu0 %940, %v1080_v0   ;;  %s1230_s6 = sld [smem:[#allocation5 + $0xd]]  ;;  %s1257_s12 = sld [smem:[#allocation5 + $0xe]] }
  0x1b   :  { %s1277_s21 = sld [smem:[#allocation5 + $0x11]]  ;;  %s1279_s2 = sld [smem:[#allocation5 + $0x12]] }
  0x1c   :  { %s1298_s28 = sld [smem:[#allocation5 + $0x14]]  ;;  %s1304_s29 = sld [smem:[#allocation5 + $0x15]] }
  0x1d   :  { %s1314_s8 = sld [smem:[#allocation5 + $0x16]]  ;;  %s1324_s3 = sld [smem:[#allocation5 + $0x17]] }
  0x1e   :  { %942 = vset.pattern.permute.xlu1 %v1019_v5  ;;  %943 = vset.pattern.permute.xlu0 %v1019_v5  ;;  %s1328_s11 = sld [smem:[#allocation5 + $0x18]]  ;;  %s1338_s16 = sld [smem:[#allocation5 + $0x19]] }
  0x1f   :  { %115 = vperm.xlu1 %942, %v1080_v0   ;;  %119 = vperm.xlu0 %943, %v1087_v3   ;;  %s1341_s17 = sld [smem:[#allocation5 + $0x1a]]  ;;  %s1348_s20 = sld [smem:[#allocation5 + $0x1b]] }
  0x20   :  { %s1360_s23 = sld [smem:[#allocation5 + $0x1c]]  ;;  %s1363_s24 = sld [smem:[#allocation5 + $0x1d]] }
  0x21   :  { %s1369_s27 = sld [smem:[#allocation5 + $0x1e]] }
  0x23   :  { %944 = vset.pattern.permute.xlu1 %v1020_v6  ;;  %945 = vset.pattern.permute.xlu0 %v1021_v7 }
  0x24   :  { %138 = vperm.xlu1 %944, %v1080_v0   ;;  %161 = vperm.xlu0 %945, %v1080_v0  }
  0x28   :  { %142 = vperm.xlu1 %944, %v1087_v3   ;;  %948 = vset.pattern.permute.xlu0 %v1022_v8 }
  0x29   :  { %188 = vperm.xlu0 %948, %v1087_v3  }
  0x2c   :  { %946 = vset.pattern.permute.xlu1 %v1021_v7 }
  0x2d   :  { %165 = vperm.xlu1 %946, %v1087_v3   ;;  %950 = vset.pattern.permute.xlu0 %v1023_v9 }
  0x2e   :  { %230 = vperm.xlu0 %950, %v1080_v0  }
  0x31   :  { %947 = vset.pattern.permute.xlu1 %v1022_v8 }
  0x32   :  { %184 = vperm.xlu1 %947, %v1080_v0   ;;  %953 = vset.pattern.permute.xlu0 %v1024_v10 }
  0x33   :  { %257 = vperm.xlu0 %953, %v1087_v3  }
  0x36   :  { %949 = vset.pattern.permute.xlu1 %v1025_v11 }
  0x37   :  { %207 = vperm.xlu1 %949, %v1080_v0   ;;  %955 = vset.pattern.permute.xlu0 %v1026_v12 }
  0x38   :  { %299 = vperm.xlu0 %955, %v1080_v0  }
  0x3b   :  { %211 = vperm.xlu1 %949, %v1087_v3  }
  0x3c   :  { %958 = vset.pattern.permute.xlu0 %v1027_v13 }
  0x3d   :  { %326 = vperm.xlu0 %958, %v1087_v3  }
  0x3f   :  { %951 = vset.pattern.permute.xlu1 %v1023_v9  ;;  %v131_v9 = vstv %s1158_s5  ;;  %s1228_s5 = sld [smem:[#allocation5 + $0xc]] }
  0x40   :  { %234 = vperm.xlu1 %951, %v1087_v3  }
  0x41   :  { %960 = vset.pattern.permute.xlu0 %v1028_v14 }
  0x42   :  { %368 = vperm.xlu0 %960, %v1080_v0  }
  0x44   :  { %952 = vset.pattern.permute.xlu1 %v1024_v10 }
  0x45   :  { %253 = vperm.xlu1 %952, %v1080_v0  }
  0x46   :  { %963 = vset.pattern.permute.xlu0 %v1029_v15 }
  0x47   :  { %395 = vperm.xlu0 %963, %v1087_v3  }
  0x49   :  { %954 = vset.pattern.permute.xlu1 %v1030_v16 }
  0x4a   :  { %276 = vperm.xlu1 %954, %v1080_v0  }
  0x4b   :  { %965 = vset.pattern.permute.xlu0 %v1031_v17 }
  0x4c   :  { %437 = vperm.xlu0 %965, %v1080_v0  }
  0x4e   :  { %280 = vperm.xlu1 %954, %v1087_v3  }
  0x50   :  { %968 = vset.pattern.permute.xlu0 %v1032_v18 }
  0x51   :  { %464 = vperm.xlu0 %968, %v1087_v3  }
  0x52   :  { %956 = vset.pattern.permute.xlu1 %v1026_v12 }
  0x53   :  { %303 = vperm.xlu1 %956, %v1087_v3  }
  0x55   :  { %970 = vset.pattern.permute.xlu0 %v1033_v19 }
  0x56   :  { %506 = vperm.xlu0 %970, %v1080_v0  }
  0x57   :  { %957 = vset.pattern.permute.xlu1 %v1027_v13  ;;  %v848_v13 = vld [vmem:[%s1394_s1 + $0x4] ss:$0 sm:$0xff] }
  0x58   :  { %322 = vperm.xlu1 %957, %v1080_v0  }
  0x5a   :  { %973 = vset.pattern.permute.xlu0 %v1034_v20 }
  0x5b   :  { %533 = vperm.xlu0 %973, %v1087_v3  }
  0x5c   :  { %959 = vset.pattern.permute.xlu1 %v1035_v21 }
  0x5d   :  { %345 = vperm.xlu1 %959, %v1080_v0  }
  0x5f   :  { %975 = vset.pattern.permute.xlu0 %v1036_v22 }
  0x60   :  { %575 = vperm.xlu0 %975, %v1080_v0  }
  0x61   :  { %349 = vperm.xlu1 %959, %v1087_v3  }
  0x64   :  { %978 = vset.pattern.permute.xlu0 %v1037_v23 }
  0x65   :  { %961 = vset.pattern.permute.xlu1 %v1028_v14  ;;  %602 = vperm.xlu0 %978, %v1087_v3  }
  0x66   :  { %372 = vperm.xlu1 %961, %v1087_v3  }
  0x69   :  { %980 = vset.pattern.permute.xlu0 %v1038_v24 }
  0x6a   :  { %962 = vset.pattern.permute.xlu1 %v1029_v15  ;;  %644 = vperm.xlu0 %980, %v1080_v0  }
  0x6b   :  { %391 = vperm.xlu1 %962, %v1080_v0  }
  0x6e   :  { %983 = vset.pattern.permute.xlu0 %v1039_v25 }
  0x6f   :  { %964 = vset.pattern.permute.xlu1 %v1040_v26  ;;  %671 = vperm.xlu0 %983, %v1087_v3  }
  0x70   :  { %414 = vperm.xlu1 %964, %v1080_v0  }
  0x73   :  { %985 = vset.pattern.permute.xlu0 %v1041_v27 }
  0x74   :  { %418 = vperm.xlu1 %964, %v1087_v3   ;;  %713 = vperm.xlu0 %985, %v1080_v0  }
  0x78   :  { %966 = vset.pattern.permute.xlu1 %v1031_v17  ;;  %988 = vset.pattern.permute.xlu0 %v1042_v28 }
  0x79   :  { %441 = vperm.xlu1 %966, %v1087_v3   ;;  %740 = vperm.xlu0 %988, %v1087_v3  }
  0x7d   :  { %967 = vset.pattern.permute.xlu1 %v1032_v18  ;;  %990 = vset.pattern.permute.xlu0 %v1043_v29 }
  0x7e   :  { %460 = vperm.xlu1 %967, %v1080_v0  }
  0x82   :  { %969 = vset.pattern.permute.xlu1 %v1044_v30 }
  0x83   :  { %483 = vperm.xlu1 %969, %v1080_v0  }
  0x87   :  { %487 = vperm.xlu1 %969, %v1087_v3  }
  0x8b   :  { %971 = vset.pattern.permute.xlu1 %v1033_v19 }
  0x8c   :  { %510 = vperm.xlu1 %971, %v1087_v3  }
  0x90   :  { %972 = vset.pattern.permute.xlu1 %v1034_v20  ;;  %v70_v32 = vpop.permute.xlu1 %69  ;;  %v46_v33 = vpop.permute.xlu0 %45  ;;  %v154_v20 = vstv %s1169_s10 }
  0x91   :  { %v57_v34 = vadd.f32 %v841_v31, %v46_v33  ;;  %529 = vperm.xlu1 %972, %v1080_v0   ;;  %v80_v43 = vadd.f32 %v842_v35, %v70_v32 }
  0x93   :  { %v59_v38 = vmax.f32 %v57_v34, 0.0  ;;  %v82_v55 = vmax.f32 %v80_v43, 0.0  ;;  %v1046_v34 = vmov 25   ;;  %v177_v43 = vstv %s851_s14 }
  0x94   :  { %v74_v36 = vpop.permute.xlu1 %73  ;;  %v51_v37 = vpop.permute.xlu0 %50 }
  0x95   :  { %v81_v39 = vadd.f32 %v842_v35, %v74_v36  ;;  %v58_v40 = vadd.f32 %v841_v31, %v51_v37  ;;  %974 = vset.pattern.permute.xlu1 %v1045_v41  ;;  %v63_v47 = vmul.f32 %v62_v42, %v59_v38  ;;  %v86_v5 = vmul.f32 %v85_v51, %v82_v55 }
  0x96   :  { %552 = vperm.xlu1 %974, %v1080_v0   ;;  %v200_v55 = vstv %s1185_s15  ;;  %s1264_s15 = sld [smem:[#allocation5 + $0xf]] }
  0x97   :  { %v83_v44 = vmax.f32 %v81_v39, 0.0  ;;  %v60_v45 = vmax.f32 %v58_v40, 0.0  ;;  %v65_v62 = vadd.f32 %v63_v47, %v39_v52 }
  0x99   :  { %v64_v48 = vmul.f32 %v62_v42, %v60_v45  ;;  %v97_v49 = vpop.permute.xlu1 %96  ;;  %v93_v50 = vpop.permute.xlu0 %92  ;;  %v87_v56 = vmul.f32 %v85_v51, %v83_v44  ;;  %v88_v11 = vadd.f32 %v86_v5, %v65_v62  ;;  %v852_v45 = vld [vmem:[%s1394_s1 + $0x6] ss:$0 sm:$0xff] }
  0x9a   :  { %v104_v53 = vadd.f32 %v844_v46, %v97_v49  ;;  %v103_v54 = vadd.f32 %v844_v46, %v93_v50  ;;  %556 = vperm.xlu1 %974, %v1087_v3  }
  0x9b   :  { %v66_v57 = vadd.f32 %v64_v48, %v39_v52 }
  0x9c   :  { %v106_v59 = vmax.f32 %v104_v53, 0.0  ;;  %v105_v60 = vmax.f32 %v103_v54, 0.0  ;;  %v854_v54 = vld [vmem:[%s1394_s1 + $0x7] ss:$0 sm:$0xff] }
  0x9d   :  { %v89_v63 = vadd.f32 %v87_v56, %v66_v57 }
  0x9e   :  { %v110_v1 = vmul.f32 %v108_v58, %v106_v59  ;;  %976 = vset.pattern.permute.xlu1 %v1036_v22  ;;  %v116_v2 = vpop.permute.xlu1 %115  ;;  %v120_v4 = vpop.permute.xlu0 %119  ;;  %v109_v6 = vmul.f32 %v108_v58, %v105_v60  ;;  %v850_v22 = vld [vmem:[%s1394_s1 + $0x5] ss:$0 sm:$0xff] }
  0x9f   :  { %v126_v7 = vadd.f32 %v846_v61, %v116_v2  ;;  %579 = vperm.xlu1 %976, %v1087_v3   ;;  %v127_v10 = vadd.f32 %v846_v61, %v120_v4  ;;  %v223_v61 = vstv %s1190_s18  ;;  %s1269_s18 = sld [smem:[#allocation5 + $0x10]] }
  0xa0   :  { %v112_v8 = vadd.f32 %v110_v1, %v89_v63  ;;  %v111_v14 = vadd.f32 %v109_v6, %v88_v11  ;;  %v856_v63 = vld [vmem:[%s1394_s1 + $0x8] ss:$0 sm:$0xff] }
  0xa1   :  { %v128_v12 = vmax.f32 %v126_v7, 0.0  ;;  %v129_v17 = vmax.f32 %v127_v10, 0.0  ;;  %v1047_v7 = vmov 28  }
  0xa3   :  { %v132_v15 = vmul.f32 %v131_v9, %v128_v12  ;;  %977 = vset.pattern.permute.xlu1 %v1037_v23  ;;  %v139_v16 = vpop.permute.xlu1 %138  ;;  %v162_v26 = vpop.permute.xlu0 %161  ;;  %v133_v31 = vmul.f32 %v131_v9, %v129_v17 }
  0xa4   :  { %v149_v18 = vadd.f32 %v848_v13, %v139_v16  ;;  %598 = vperm.xlu1 %977, %v1080_v0   ;;  %v172_v35 = vadd.f32 %v850_v22, %v162_v26  ;;  %v246_v16 = vstv %s857_s22 }
  0xa5   :  { %v134_v19 = vadd.f32 %v132_v15, %v111_v14  ;;  %v135_v37 = vadd.f32 %v133_v31, %v112_v8 }
  0xa6   :  { %v151_v21 = vmax.f32 %v149_v18, 0.0  ;;  %v174_v41 = vmax.f32 %v172_v35, 0.0  ;;  %v858_v18 = vld [vmem:[%s1394_s1 + $0x9] ss:$0 sm:$0xff] }
  0xa7   :  { %v143_v30 = vpop.permute.xlu1 %142 }
  0xa8   :  { %v155_v32 = vmul.f32 %v154_v20, %v151_v21  ;;  %v150_v33 = vadd.f32 %v848_v13, %v143_v30  ;;  %979 = vset.pattern.permute.xlu1 %v1046_v34  ;;  %v189_v46 = vpop.permute.xlu0 %188  ;;  %v178_v49 = vmul.f32 %v177_v43, %v174_v41  ;;  %v269_v34 = vstv %s1206_s0  ;;  %v862_v41 = vld [vmem:[%s1394_s1 + $0xb] ss:$0 sm:$0xff] }
  0xa9   :  { %621 = vperm.xlu1 %979, %v1080_v0   ;;  %v196_v52 = vadd.f32 %v852_v45, %v189_v46 }
  0xaa   :  { %v157_v23 = vadd.f32 %v155_v32, %v134_v19  ;;  %v152_v36 = vmax.f32 %v150_v33, 0.0  ;;  %v860_v33 = vld [vmem:[%s1394_s1 + $0xa] ss:$0 sm:$0xff] }
  0xac   :  { %v156_v38 = vmul.f32 %v154_v20, %v152_v36  ;;  %v166_v39 = vpop.permute.xlu1 %165  ;;  %v180_v56 = vadd.f32 %v178_v49, %v157_v23 }
  0xad   :  { %v173_v40 = vadd.f32 %v850_v22, %v166_v39  ;;  %625 = vperm.xlu1 %979, %v1087_v3   ;;  %v231_v1 = vpop.permute.xlu0 %230  ;;  %v292_v39 = vstv %s1211_s25  ;;  %s1289_s25 = sld [smem:[#allocation5 + $0x13]] }
  0xae   :  { %v158_v42 = vadd.f32 %v156_v38, %v135_v37  ;;  %v241_v8 = vadd.f32 %v856_v63, %v231_v1 }
  0xaf   :  { %v175_v44 = vmax.f32 %v173_v40, 0.0 }
  0xb0   :  { %v243_v14 = vmax.f32 %v241_v8, 0.0 }
  0xb1   :  { %v179_v47 = vmul.f32 %v177_v43, %v175_v44  ;;  %981 = vset.pattern.permute.xlu1 %v1038_v24  ;;  %v185_v48 = vpop.permute.xlu1 %184  ;;  %v198_v24 = vmax.f32 %v196_v52, 0.0 }
  0xb2   :  { %v195_v50 = vadd.f32 %v852_v45, %v185_v48  ;;  %648 = vperm.xlu1 %981, %v1087_v3   ;;  %v258_v19 = vpop.permute.xlu0 %257  ;;  %v247_v22 = vmul.f32 %v246_v16, %v243_v14 }
  0xb3   :  { %v181_v51 = vadd.f32 %v179_v47, %v158_v42  ;;  %v202_v4 = vmul.f32 %v200_v55, %v198_v24  ;;  %v265_v31 = vadd.f32 %v858_v18, %v258_v19 }
  0xb4   :  { %v197_v53 = vmax.f32 %v195_v50, 0.0 }
  0xb5   :  { %v204_v10 = vadd.f32 %v202_v4, %v181_v51 }
  0xb6   :  { %v201_v57 = vmul.f32 %v200_v55, %v197_v53  ;;  %982 = vset.pattern.permute.xlu1 %v1039_v25  ;;  %v208_v58 = vpop.permute.xlu1 %207  ;;  %v315_v55 = vstv %s863_s30  ;;  %s1375_s30 = sld [smem:[#allocation5 + $0x1f]] }
  0xb7   :  { %v218_v59 = vadd.f32 %v854_v54, %v208_v58  ;;  %667 = vperm.xlu1 %982, %v1080_v0   ;;  %v300_v42 = vpop.permute.xlu0 %299 }
  0xb8   :  { %v203_v60 = vadd.f32 %v201_v57, %v180_v56  ;;  %v310_v47 = vadd.f32 %v862_v41, %v300_v42 }
  0xb9   :  { %v220_v62 = vmax.f32 %v218_v59, 0.0 }
  0xba   :  { %v212_v2 = vpop.permute.xlu1 %211  ;;  %v312_v53 = vmax.f32 %v310_v47, 0.0 }
  0xbb   :  { %v224_v5 = vmul.f32 %v223_v61, %v220_v62  ;;  %v219_v6 = vadd.f32 %v854_v54, %v212_v2  ;;  %984 = vset.pattern.permute.xlu1 %v1047_v7  ;;  %v338_v62 = vstv %s1228_s5 }
  0xbc   :  { %690 = vperm.xlu1 %984, %v1080_v0   ;;  %v316_v58 = vmul.f32 %v315_v55, %v312_v53 }
  0xbd   :  { %v226_v25 = vadd.f32 %v224_v5, %v203_v60  ;;  %v221_v9 = vmax.f32 %v219_v6, 0.0  ;;  %v361_v6 = vstv %s1230_s6 }
  0xbf   :  { %v225_v11 = vmul.f32 %v223_v61, %v221_v9  ;;  %v235_v12 = vpop.permute.xlu1 %234  ;;  %v249_v23 = vadd.f32 %v247_v22, %v226_v25  ;;  %v866_v61 = vld [vmem:[%s1394_s1 + $0xd] ss:$0 sm:$0xff] }
  0xc0   :  { %v242_v13 = vadd.f32 %v856_v63, %v235_v12  ;;  %694 = vperm.xlu1 %984, %v1087_v3  }
  0xc1   :  { %v227_v15 = vadd.f32 %v225_v11, %v204_v10 }
  0xc2   :  { %v244_v17 = vmax.f32 %v242_v13, 0.0 }
  0xc4   :  { %v248_v20 = vmul.f32 %v246_v16, %v244_v17  ;;  %986 = vset.pattern.permute.xlu1 %v1041_v27  ;;  %v254_v21 = vpop.permute.xlu1 %253  ;;  %v267_v27 = vmax.f32 %v265_v31, 0.0  ;;  %v868_v31 = vld [vmem:[%s1394_s1 + $0xe] ss:$0 sm:$0xff] }
  0xc5   :  { %v264_v26 = vadd.f32 %v858_v18, %v254_v21  ;;  %717 = vperm.xlu1 %986, %v1087_v3   ;;  %v327_v21 = vpop.permute.xlu0 %326 }
  0xc6   :  { %v250_v30 = vadd.f32 %v248_v20, %v227_v15  ;;  %v271_v44 = vmul.f32 %v269_v34, %v267_v27 }
  0xc7   :  { %v266_v32 = vmax.f32 %v264_v26, 0.0 }
  0xc8   :  { %v273_v49 = vadd.f32 %v271_v44, %v250_v30 }
  0xc9   :  { %v270_v35 = vmul.f32 %v269_v34, %v266_v32  ;;  %987 = vset.pattern.permute.xlu1 %v1042_v28  ;;  %v277_v36 = vpop.permute.xlu1 %276  ;;  %v369_v30 = vpop.permute.xlu0 %368 }
  0xca   :  { %v287_v37 = vadd.f32 %v860_v33, %v277_v36  ;;  %736 = vperm.xlu1 %987, %v1080_v0   ;;  %v870_v36 = vld [vmem:[%s1394_s1 + $0xf] ss:$0 sm:$0xff] }
  0xcb   :  { %v272_v38 = vadd.f32 %v270_v35, %v249_v23  ;;  %v379_v35 = vadd.f32 %v868_v31, %v369_v30 }
  0xcc   :  { %v289_v40 = vmax.f32 %v287_v37, 0.0 }
  0xcd   :  { %v281_v43 = vpop.permute.xlu1 %280  ;;  %v396_v27 = vpop.permute.xlu0 %395 }
  0xce   :  { %v293_v45 = vmul.f32 %v292_v39, %v289_v40  ;;  %v288_v46 = vadd.f32 %v860_v33, %v281_v43  ;;  %989 = vset.pattern.permute.xlu1 %v1043_v29  ;;  %v403_v42 = vadd.f32 %v870_v36, %v396_v27  ;;  %v381_v43 = vmax.f32 %v379_v35, 0.0 }
  0xcf   :  { %759 = vperm.xlu1 %989, %v1080_v0   ;;  %v864_v0 = vld [vmem:[%s1394_s1 + $0xc] ss:$0 sm:$0xff] }
  0xd0   :  { %v295_v28 = vadd.f32 %v293_v45, %v272_v38  ;;  %v290_v48 = vmax.f32 %v288_v46, 0.0  ;;  %v334_v26 = vadd.f32 %v864_v0, %v327_v21  ;;  %v872_v38 = vld [vmem:[%s1394_s1 + $0x10] ss:$0 sm:$0xff]  ;;  %v405_v53 = vmax.f32 %v403_v42, 0.0 }
  0xd1   :  { %v438_v45 = vpop.permute.xlu0 %437 }
  0xd2   :  { %v294_v50 = vmul.f32 %v292_v39, %v290_v48  ;;  %v304_v51 = vpop.permute.xlu1 %303  ;;  %v318_v63 = vadd.f32 %v316_v58, %v295_v28  ;;  %v336_v33 = vmax.f32 %v334_v26, 0.0  ;;  %v384_v28 = vstv %s1257_s12  ;;  %v874_v48 = vld [vmem:[%s1394_s1 + $0x11] ss:$0 sm:$0xff] }
  0xd3   :  { %v311_v52 = vadd.f32 %v862_v41, %v304_v51  ;;  %763 = vperm.xlu1 %989, %v1087_v3   ;;  %v1048_v3 = vmov 0.0   ;;  %v476_v26 = vstv %s1279_s2 }
  0xd4   :  { %v296_v54 = vadd.f32 %v294_v50, %v273_v49  ;;  %36 = vst.msk [vmem:[#allocation2] sm:$0x1] %vm35_vm0, %v1048_v3  ;;  %37 = vst.msk [vmem:[#allocation3] sm:$0x1] %vm35_vm0, %v1048_v3  ;;  %v340_v40 = vmul.f32 %v338_v62, %v336_v33  ;;  %v430_v3 = vstv %s1269_s18 }
  0xd5   :  { %v313_v56 = vmax.f32 %v311_v52, 0.0  ;;  %v465_v58 = vpop.permute.xlu0 %464 }
  0xd7   :  { %v317_v29 = vmul.f32 %v315_v55, %v313_v56  ;;  %v323_v57 = vpop.permute.xlu1 %322  ;;  %v385_v55 = vmul.f32 %v384_v28, %v381_v43  ;;  %v407_v56 = vstv %s1264_s15 }
  0xd8   :  { %v333_v24 = vadd.f32 %v864_v0, %v323_v57  ;;  %v448_v0 = vadd.f32 %v874_v48, %v438_v45  ;;  %v876_v57 = vld [vmem:[%s1394_s1 + $0x12] ss:$0 sm:$0xff] }
  0xd9   :  { %v319_v59 = vadd.f32 %v317_v29, %v296_v54 }
  0xda   :  { %v335_v60 = vmax.f32 %v333_v24, 0.0 }
  0xdb   :  { %v342_v51 = vadd.f32 %v340_v40, %v319_v59  ;;  %v878_v59 = vld [vmem:[%s1394_s1 + $0x13] ss:$0 sm:$0xff]  ;;  %v884_v40 = vld [vmem:[%s1394_s1 + $0x16] ss:$0 sm:$0xff] }
  0xdc   :  { %v339_v1 = vmul.f32 %v338_v62, %v335_v60  ;;  %v346_v2 = vpop.permute.xlu1 %345 }
  0xdd   :  { %v356_v4 = vadd.f32 %v866_v61, %v346_v2  ;;  %v409_v2 = vmul.f32 %v407_v56, %v405_v53 }
  0xde   :  { %v341_v5 = vadd.f32 %v339_v1, %v318_v63 }
  0xdf   :  { %v358_v7 = vmax.f32 %v356_v4, 0.0 }
  0xe0   :  { %v350_v25 = vpop.permute.xlu1 %349 }
  0xe1   :  { %v362_v8 = vmul.f32 %v361_v6, %v358_v7  ;;  %v357_v32 = vadd.f32 %v866_v61, %v350_v25  ;;  %v450_v25 = vmax.f32 %v448_v0, 0.0 }
  0xe3   :  { %v1242_v9 = vadd.f32 %v362_v8, %v341_v5  ;;  %v359_v37 = vmax.f32 %v357_v32, 0.0  ;;  %v472_v5 = vadd.f32 %v876_v57, %v465_v58 }
  0xe5   :  { %v373_v10 = vpop.permute.xlu1 %372  ;;  %v363_v47 = vmul.f32 %v361_v6, %v359_v37  ;;  %v387_v6 = vadd.f32 %v385_v55, %v1242_v9 }
  0xe6   :  { %v380_v34 = vadd.f32 %v868_v31, %v373_v10  ;;  %v507_v10 = vpop.permute.xlu0 %506  ;;  %v474_v31 = vmax.f32 %v472_v5, 0.0  ;;  %v890_v5 = vld [vmem:[%s1394_s1 + $0x19] ss:$0 sm:$0xff] }
  0xe7   :  { %v365_v24 = vadd.f32 %v363_v47, %v342_v51 }
  0xe8   :  { %v382_v41 = vmax.f32 %v380_v34, 0.0 }
  0xea   :  { %v392_v11 = vpop.permute.xlu1 %391  ;;  %v386_v52 = vmul.f32 %v384_v28, %v382_v41  ;;  %v534_v27 = vpop.permute.xlu0 %533 }
  0xeb   :  { %v402_v39 = vadd.f32 %v870_v36, %v392_v11  ;;  %v453_v11 = vstv %s1277_s21 }
  0xec   :  { %v388_v1 = vadd.f32 %v386_v52, %v365_v24  ;;  %v454_v34 = vmul.f32 %v453_v11, %v450_v25  ;;  %v522_v52 = vstv %s1298_s28 }
  0xed   :  { %v404_v50 = vmax.f32 %v402_v39, 0.0 }
  0xee   :  { %v576_v51 = vpop.permute.xlu0 %575 }
  0xef   :  { %v415_v12 = vpop.permute.xlu1 %414  ;;  %v408_v62 = vmul.f32 %v407_v56, %v404_v50  ;;  %v545_v56 = vstv %s1304_s29 }
  0xf0   :  { %v425_v44 = vadd.f32 %v872_v38, %v415_v12 }
  0xf1   :  { %v410_v21 = vadd.f32 %v408_v62, %v387_v6 }
  0xf2   :  { %v427_v29 = vmax.f32 %v425_v44, 0.0  ;;  %v478_v44 = vmul.f32 %v476_v26, %v474_v31  ;;  %v614_v31 = vstv %s1328_s11 }
  0xf3   :  { %v419_v13 = vpop.permute.xlu1 %418 }
  0xf4   :  { %v426_v49 = vadd.f32 %v872_v38, %v419_v13  ;;  %v431_v7 = vmul.f32 %v430_v3, %v427_v29  ;;  %v880_v13 = vld [vmem:[%s1394_s1 + $0x14] ss:$0 sm:$0xff]  ;;  %v499_v38 = vstv %s1289_s25 }
  0xf5   :  { %v517_v36 = vadd.f32 %v880_v13, %v507_v10 }
  0xf6   :  { %v428_v60 = vmax.f32 %v426_v49, 0.0  ;;  %v433_v33 = vadd.f32 %v431_v7, %v410_v21  ;;  %v892_v21 = vld [vmem:[%s1394_s1 + $0x1a] ss:$0 sm:$0xff] }
  0xf7   :  { %v519_v49 = vmax.f32 %v517_v36, 0.0 }
  0xf8   :  { %v442_v14 = vpop.permute.xlu1 %441  ;;  %v432_v12 = vmul.f32 %v430_v3, %v428_v60  ;;  %v456_v47 = vadd.f32 %v454_v34, %v433_v33 }
  0xf9   :  { %v449_v54 = vadd.f32 %v874_v48, %v442_v14  ;;  %v523_v60 = vmul.f32 %v522_v52, %v519_v49 }
  0xfb   :  { %v451_v4 = vmax.f32 %v449_v54, 0.0  ;;  %v886_v54 = vld [vmem:[%s1394_s1 + $0x17] ss:$0 sm:$0xff] }
  0xfc   :  { %v586_v62 = vadd.f32 %v886_v54, %v576_v51 }
  0xfd   :  { %v461_v15 = vpop.permute.xlu1 %460  ;;  %v455_v30 = vmul.f32 %v453_v11, %v451_v4 }
  0xfe   :  { %v471_v63 = vadd.f32 %v876_v57, %v461_v15 }
 0x100   :  { %v473_v9 = vmax.f32 %v471_v63, 0.0  ;;  %v603_v63 = vpop.permute.xlu0 %602 }
 0x102   :  { %v484_v16 = vpop.permute.xlu1 %483 }
 0x103   :  { %v494_v8 = vadd.f32 %v878_v59, %v484_v16  ;;  %v411_v16 = vadd.f32 %v409_v2, %v388_v1  ;;  %v568_v2 = vstv %s1314_s8 }
 0x105   :  { %v496_v35 = vmax.f32 %v494_v8, 0.0  ;;  %v434_v37 = vadd.f32 %v432_v12, %v411_v16  ;;  %v591_v16 = vstv %s1324_s3 }
 0x106   :  { %v1244_v17 = vpop.permute.xlu1 %487 }
 0x107   :  { %v495_v14 = vadd.f32 %v878_v59, %v1244_v17  ;;  %v882_v17 = vld [vmem:[%s1394_s1 + $0x15] ss:$0 sm:$0xff]  ;;  %v457_v43 = vadd.f32 %v455_v30, %v434_v37  ;;  %v500_v48 = vmul.f32 %v499_v38, %v496_v35 }
 0x108   :  { %v541_v28 = vadd.f32 %v882_v17, %v534_v27 }
 0x109   :  { %v497_v39 = vmax.f32 %v495_v14, 0.0  ;;  %v480_v0 = vadd.f32 %v478_v44, %v457_v43  ;;  %v637_v43 = vstv %s1338_s16 }
 0x10b   :  { %v1246_v18 = vpop.permute.xlu1 %510  ;;  %v501_v53 = vmul.f32 %v499_v38, %v497_v39  ;;  %v894_v39 = vld [vmem:[%s1394_s1 + $0x1b] ss:$0 sm:$0xff] }
 0x10c   :  { %v518_v32 = vadd.f32 %v880_v13, %v1246_v18  ;;  %v477_v18 = vmul.f32 %v476_v26, %v473_v9  ;;  %v588_v13 = vmax.f32 %v586_v62, 0.0  ;;  %v645_v26 = vpop.permute.xlu0 %644 }
 0x10d   :  { %v503_v1 = vadd.f32 %v501_v53, %v480_v0  ;;  %v655_v36 = vadd.f32 %v892_v21, %v645_v26 }
 0x10e   :  { %v520_v45 = vmax.f32 %v518_v32, 0.0  ;;  %v479_v55 = vadd.f32 %v477_v18, %v456_v47  ;;  %v592_v27 = vmul.f32 %v591_v16, %v588_v13 }
 0x10f   :  { %v657_v49 = vmax.f32 %v655_v36, 0.0 }
 0x110   :  { %v1248_v19 = vpop.permute.xlu1 %529  ;;  %v524_v57 = vmul.f32 %v522_v52, %v520_v45  ;;  %v502_v3 = vadd.f32 %v500_v48, %v479_v55  ;;  %v660_v45 = vstv %s1341_s17 }
 0x111   :  { %v540_v41 = vadd.f32 %v882_v17, %v1248_v19 }
 0x112   :  { %v526_v7 = vadd.f32 %v524_v57, %v503_v1  ;;  %v525_v11 = vadd.f32 %v523_v60, %v502_v3  ;;  %v661_v3 = vmul.f32 %v660_v45, %v657_v49 }
 0x113   :  { %v542_v29 = vmax.f32 %v540_v41, 0.0 }
 0x115   :  { %v1250_v20 = vpop.permute.xlu1 %552 }
 0x116   :  { %v563_v50 = vadd.f32 %v884_v40, %v1250_v20  ;;  %v543_v20 = vmax.f32 %v541_v28, 0.0 }
 0x118   :  { %v565_v59 = vmax.f32 %v563_v50, 0.0  ;;  %v547_v25 = vmul.f32 %v545_v56, %v543_v20 }
 0x119   :  { %v1252_v22 = vpop.permute.xlu1 %556 }
 0x11a   :  { %v564_v19 = vadd.f32 %v884_v40, %v1252_v22  ;;  %v888_v22 = vld [vmem:[%s1394_s1 + $0x18] ss:$0 sm:$0xff]  ;;  %v569_v12 = vmul.f32 %v568_v2, %v565_v59  ;;  %v549_v34 = vadd.f32 %v547_v25, %v526_v7  ;;  %v672_v40 = vpop.permute.xlu0 %671  ;;  %v729_v7 = vstv %s1363_s24 }
 0x11b   :  { %v610_v10 = vadd.f32 %v888_v22, %v603_v63  ;;  %v679_v50 = vadd.f32 %v894_v39, %v672_v40 }
 0x11c   :  { %v566_v4 = vmax.f32 %v564_v19, 0.0  ;;  %v898_v19 = vld [vmem:[%s1394_s1 + $0x1d] ss:$0 sm:$0xff] }
 0x11d   :  { %v681_v60 = vmax.f32 %v679_v50, 0.0 }
 0x11e   :  { %v1259_v23 = vpop.permute.xlu1 %579  ;;  %v714_v55 = vpop.permute.xlu0 %713 }
 0x11f   :  { %v587_v58 = vadd.f32 %v886_v54, %v1259_v23  ;;  %v546_v23 = vmul.f32 %v545_v56, %v542_v29  ;;  %v683_v56 = vstv %s1348_s20  ;;  %v724_v59 = vadd.f32 %v898_v19, %v714_v55 }
 0x121   :  { %v589_v8 = vmax.f32 %v587_v58, 0.0  ;;  %v548_v30 = vadd.f32 %v546_v23, %v525_v11  ;;  %v726_v11 = vmax.f32 %v724_v59, 0.0 }
 0x123   :  { %v1271_v46 = vpop.permute.xlu1 %598  ;;  %v593_v35 = vmul.f32 %v591_v16, %v589_v8  ;;  %v571_v17 = vadd.f32 %v569_v12, %v548_v30  ;;  %v902_v16 = vld [vmem:[%s1394_s1 + $0x1f] ss:$0 sm:$0xff] }
 0x124   :  { %v609_v6 = vadd.f32 %v888_v22, %v1271_v46  ;;  %v570_v46 = vmul.f32 %v568_v2, %v566_v4  ;;  %v900_v2 = vld [vmem:[%s1394_s1 + $0x1e] ss:$0 sm:$0xff]  ;;  %v741_v4 = vpop.permute.xlu0 %740 }
 0x125   :  { %v594_v51 = vadd.f32 %v592_v27, %v571_v17  ;;  %v748_v12 = vadd.f32 %v900_v2, %v741_v4 }
 0x126   :  { %v611_v32 = vmax.f32 %v609_v6, 0.0  ;;  %v572_v41 = vadd.f32 %v570_v46, %v549_v34 }
 0x127   :  { %v750_v34 = vmax.f32 %v748_v12, 0.0 }
 0x128   :  { %v1291_v61 = vpop.permute.xlu1 %621  ;;  %v615_v44 = vmul.f32 %v614_v31, %v611_v32  ;;  %v730_v32 = vmul.f32 %v729_v7, %v726_v11 }
 0x129   :  { %v632_v14 = vadd.f32 %v890_v5, %v1291_v61  ;;  %v612_v61 = vmax.f32 %v610_v10, 0.0  ;;  %v685_v10 = vmul.f32 %v683_v56, %v681_v60 }
 0x12a   :  { %v617_v0 = vadd.f32 %v615_v44, %v594_v51 }
 0x12b   :  { %v634_v37 = vmax.f32 %v632_v14, 0.0  ;;  %v616_v48 = vmul.f32 %v614_v31, %v612_v61 }
 0x12c   :  { %v1301_v15 = vpop.permute.xlu1 %625 }
 0x12d   :  { %v633_v33 = vadd.f32 %v890_v5, %v1301_v15  ;;  %v896_v15 = vld [vmem:[%s1394_s1 + $0x1c] ss:$0 sm:$0xff]  ;;  %v638_v52 = vmul.f32 %v637_v43, %v634_v37  ;;  %v706_v5 = vstv %s1360_s23  ;;  %v775_v37 = vstv %s1375_s30 }
 0x12f   :  { %v635_v28 = vmax.f32 %v633_v33, 0.0  ;;  %v640_v62 = vadd.f32 %v638_v52, %v617_v0  ;;  %v752_v33 = vstv %s1369_s27 }
 0x131   :  { %v1317_v42 = vpop.permute.xlu1 %648  ;;  %v639_v57 = vmul.f32 %v637_v43, %v635_v28  ;;  %v663_v14 = vadd.f32 %v661_v3, %v640_v62 }
 0x132   :  { %v656_v38 = vadd.f32 %v892_v21, %v1317_v42  ;;  %v595_v42 = vadd.f32 %v593_v35, %v572_v41 }
 0x134   :  { %v658_v53 = vmax.f32 %v656_v38, 0.0 }
 0x136   :  { %v668_v24 = vpop.permute.xlu1 %667  ;;  %v662_v22 = vmul.f32 %v660_v45, %v658_v53 }
 0x137   :  { %v678_v47 = vadd.f32 %v894_v39, %v668_v24  ;;  %v618_v24 = vadd.f32 %v616_v48, %v595_v42 }
 0x139   :  { %v680_v20 = vmax.f32 %v678_v47, 0.0  ;;  %v641_v23 = vadd.f32 %v639_v57, %v618_v24 }
 0x13b   :  { %v691_v9 = vpop.permute.xlu1 %690  ;;  %v684_v6 = vmul.f32 %v683_v56, %v680_v20  ;;  %v664_v21 = vadd.f32 %v662_v22, %v641_v23  ;;  %v780_v20 = vld [vmem:[#allocation2] sm:$0x1] }
 0x13c   :  { %v701_v54 = vadd.f32 %v896_v15, %v691_v9 }
 0x13d   :  { %v686_v46 = vadd.f32 %v684_v6, %v663_v14  ;;  %v687_v61 = vadd.f32 %v685_v10, %v664_v21  ;;  %v813_v14 = vld [vmem:[#allocation3] sm:$0x1] }
 0x13e   :  { %v703_v63 = vmax.f32 %v701_v54, 0.0 }
 0x13f   :  { %v695_v18 = vpop.permute.xlu1 %694 }
 0x140   :  { %v702_v58 = vadd.f32 %v896_v15, %v695_v18  ;;  %v707_v26 = vmul.f32 %v706_v5, %v703_v63  ;;  %v754_v18 = vmul.f32 %v752_v33, %v750_v34 }
 0x142   :  { %v704_v25 = vmax.f32 %v702_v58, 0.0  ;;  %v709_v36 = vadd.f32 %v707_v26, %v686_v46 }
 0x144   :  { %v718_v29 = vpop.permute.xlu1 %717  ;;  %v708_v30 = vmul.f32 %v706_v5, %v704_v25  ;;  %v732_v43 = vadd.f32 %v730_v32, %v709_v36 }
 0x145   :  { %v725_v1 = vadd.f32 %v898_v19, %v718_v29  ;;  %v793_v19 = vlaneseq }
 0x146   :  { %v710_v38 = vadd.f32 %v708_v30, %v687_v61 }
 0x147   :  { %v727_v9 = vmax.f32 %v725_v1, 0.0  ;;  %v794_v29 = vshrl.u32 %v793_v19, 7 }
 0x149   :  { %v737_v8 = vpop.permute.xlu1 %736  ;;  %v731_v17 = vmul.f32 %v729_v7, %v727_v9  ;;  %v795_v58 = vsub.s32 0, %v794_v29 }
 0x14a   :  { %v747_v13 = vadd.f32 %v900_v2, %v737_v8 }
 0x14b   :  { %v733_v15 = vadd.f32 %v731_v17, %v710_v38 }
 0x14c   :  { %v749_v31 = vmax.f32 %v747_v13, 0.0 }
 0x14d   :  { %v756_v42 = vadd.f32 %v754_v18, %v733_v15 }
 0x14e   :  { %v760_v35 = vpop.permute.xlu1 %759  ;;  %v753_v39 = vmul.f32 %v752_v33, %v749_v31 }
 0x14f   :  { %v770_v27 = vadd.f32 %v902_v16, %v760_v35 }
 0x150   :  { %v755_v28 = vadd.f32 %v753_v39, %v732_v43 }
 0x151   :  { %v772_v40 = vmax.f32 %v770_v27, 0.0 }
 0x152   :  { %v764_v41 = vpop.permute.xlu1 %763 }
 0x153   :  { %v776_v44 = vmul.f32 %v775_v37, %v772_v40  ;;  %v771_v45 = vadd.f32 %v902_v16, %v764_v41 }
 0x155   :  { %v773_v47 = vmax.f32 %v771_v45, 0.0  ;;  %v778_v48 = vadd.f32 %v776_v44, %v755_v28 }
 0x157   :  { %v777_v49 = vmul.f32 %v775_v37, %v773_v47  ;;  %v782_v51 = vsel %vm781_vm1, %v778_v48, -inf }
 0x159   :  { %v779_v50 = vadd.f32 %v777_v49, %v756_v42 }
 0x15b   :  { %v783_v52 = vsel %vm781_vm1, %v779_v50, -inf }
 0x15c   :  { %v784_v53 = vmax.f32 %v782_v51, %v783_v52 }
 0x15e   :  { %v785_v54 = vrot.slane %v784_v53, 4 }
 0x160   :  { %v786_v55 = vmax.f32 %v784_v53, %v785_v54 }
 0x162   :  { %v787_v56 = vrot.slane %v786_v55, 2 }
 0x164   :  { %v788_v0 = vmax.f32 %v786_v55, %v787_v56 }
 0x166   :  { %v789_v57 = vrot.slane %v788_v0, 1 }
 0x168   :  { %v790_v24 = vmax.f32 %v788_v0, %v789_v57 }
 0x16a   :  { %v791_v3 = vmax.f32 %v780_v20, %v790_v24 }
 0x16c   :  { %v796_v60 = vrot.slane %v791_v3, %v795_v58  ;;  %826 = vst.msk [vmem:[#allocation2] sm:$0x1] %vm35_vm0, %v791_v3  ;;  %v814_v1 = vsub.f32 %v780_v20, %v791_v3  ;;  %v818_v2 = vsub.f32 0.0, %v791_v3 }
 0x16e   :  { %v798_v59 = vsub.f32 %v778_v48, %v796_v60  ;;  %v799_v62 = vsub.f32 %v779_v50, %v796_v60  ;;  %v815_v4 = vmul.f32 1.442695, %v814_v1  ;;  %v819_v5 = vmul.f32 1.442695, %v818_v2 }
 0x170   :  { %v800_v22 = vmul.f32 1.442695, %v798_v59  ;;  %v802_v63 = vmul.f32 1.442695, %v799_v62 }
 0x172   :  { %991 = vpow2.f32 %v800_v22 }
 0x173   :  { %993 = vpow2.f32 %v802_v63  ;;  %v830_v61 = vld [vmem:[#allocation2] sm:$0x1] }
 0x174   :  { %995 = vpow2.f32 %v815_v4 }
 0x175   :  { %997 = vpow2.f32 %v819_v5 }
 0x17c   :  { %v992_v23 = vpop.eup %991 }
 0x17d   :  { %v994_v6 = vpop.eup %993  ;;  %v804_v7 = vsel %vm781_vm1, %v992_v23, 0.0 }
 0x17e   :  { %v805_v25 = vsel %vm781_vm1, %v994_v6, 0.0  ;;  %v996_v11 = vpop.eup %995 }
 0x17f   :  { %v806_v8 = vadd.f32 %v805_v25, %v804_v7  ;;  %v998_v13 = vpop.eup %997  ;;  %v817_v9 = vmul.f32 %v996_v11, %v813_v14 }
 0x180   :  { %v821_v16 = vmul.f32 16.0, %v998_v13 }
 0x181   :  { %v807_v10 = vrot.slane %v806_v8, 4 }
 0x182   :  { %v822_v31 = vadd.f32 %v821_v16, %v817_v9 }
 0x183   :  { %v808_v12 = vadd.f32 %v807_v10, %v806_v8 }
 0x185   :  { %v809_v21 = vrot.slane %v808_v12, 2 }
 0x187   :  { %v810_v26 = vadd.f32 %v809_v21, %v808_v12 }
 0x189   :  { %v811_v46 = vrot.slane %v810_v26, 1 }
 0x18b   :  { %v812_v30 = vadd.f32 %v811_v46, %v810_v26 }
 0x18d   :  { %v823_v32 = vadd.f32 %v822_v31, %v812_v30 }
 0x18f   :  { %825 = vst.msk [vmem:[#allocation3] sm:$0x1] %vm35_vm0, %v823_v32 }
 0x196   :  { %v831_v33 = vld [vmem:[#allocation3] sm:$0x1] }
 0x197   :  { %999 = vlog2.f32 %v831_v33 }
 0x1a1   :  { %v1000_v34 = vpop.eup %999 }
 0x1a2   :  { %v833_v35 = vmul.f32 0.6931472, %v1000_v34 }
 0x1a4   :  { %v834_v36 = vadd.f32 %v833_v35, %v830_v61 }
 0x1a6   :  { %835 = vst.msk [vmem:[%s1397_s4] sm:$0x1] %vm35_vm0, %v834_v36 }
 0x1a7   :  { %840 = vsyncpa [#allocation6], 1 }

</bundles_post_ra>
